<compile_context>
chip_gen: v5e
topology: v5e:2x2
jax: 0.10.0
libtpu: 0.0.40
codegen_flags: <defaults>
</compile_context>

<pallas_src>
import math
from functools import partial

import jax
import jax.numpy as jnp
from jax import lax
from jax.experimental import pallas as pl
from jax.experimental.pallas import tpu as pltpu


# ----------------------------- config ---------------------------------------
class Config:
    n_vocab = 50
    n_seq = 8
    d_embed = 32
    n_layer = 2
    n_head = 4
    d_head = 8
    d_ff = 64
    n_output = 3
    i_pad = 0
    layer_norm_epsilon = 1e-12
    dropout = 0.0  # identity at inference


CFG = Config()


# --------------------------- in-kernel helpers -------------------------------
def _gelu(x):
    # matches torch ref: 0.5*x*(1 + tanh(sqrt(2/pi)*(x + 0.044715*x^3)))  (f32)
    return 0.5 * x * (1.0 + jnp.tanh(math.sqrt(2.0 / math.pi) * (x + 0.044715 * x * x * x)))


def _layer_norm(x, gamma, beta, eps):
    mu = jnp.mean(x, axis=-1, keepdims=True)
    var = jnp.mean((x - mu) ** 2, axis=-1, keepdims=True)
    return (x - mu) * lax.rsqrt(var + eps) * gamma + beta


# ----------------------- fused forward kernel (one batch row / grid step) ----
def bert_forward_kernel(
    idx_ref, bias_ref, emb_ref,
    wqkv_ref, bqkv_ref, wo_ref, bo_ref,
    ln1g_ref, ln1b_ref, w1_ref, b1_ref, w2_ref, b2_ref, ln2g_ref, ln2b_ref,
    clsw_ref, clsb_ref,
    out_ref,
    *, S, n_layer, n_head, d_head, emb_rows, eps,
):
    f32 = jnp.float32
    bf16 = jnp.bfloat16
    hd = n_head * d_head

    idx = idx_ref[0]        # (S, 3) int32: [tok_id, n_vocab+pos, n_vocab+S+1+seg]
    bias = bias_ref[0]      # (1, S)  f32 additive mask (-1e9 at padded key tokens)

    # ---- fused [tok; pos; seg] embedding via ONE multi-hot matmul ----
    iota = lax.broadcasted_iota(jnp.int32, (S, emb_rows), 1)
    hot = ((iota == idx[:, 0:1]).astype(f32)
           + (iota == idx[:, 1:2]).astype(f32)
           + (iota == idx[:, 2:3]).astype(f32)).astype(bf16)        # (S, emb_rows)
    x = jnp.dot(hot, emb_ref[...], preferred_element_type=f32)      # (S, D) f32

    # ---- encoder layers (weights stacked along leading n_layer axis) ----
    for l in range(n_layer):
        x_b = x.astype(bf16)
        # fused Q/K/V projection; 1/sqrt(d_head) already folded into the Q slice
        qkv = jnp.dot(x_b, wqkv_ref[l], preferred_element_type=f32) + bqkv_ref[l]  # (S, 3*hd)

        qh = jnp.transpose(qkv[:, 0 * hd:1 * hd].reshape(S, n_head, d_head), (1, 0, 2)).astype(bf16)
        kh = jnp.transpose(qkv[:, 1 * hd:2 * hd].reshape(S, n_head, d_head), (1, 0, 2)).astype(bf16)
        vh = jnp.transpose(qkv[:, 2 * hd:3 * hd].reshape(S, n_head, d_head), (1, 0, 2)).astype(bf16)

        # batched-over-head attention (single score matmul + single attn@V matmul)
        scores = jnp.einsum('hqd,hkd->hqk', qh, kh,
                            preferred_element_type=f32) + bias                      # (H, S, S)
        m = jnp.max(scores, axis=-1, keepdims=True)
        e = jnp.exp(scores - m)
        attn = e * pl.reciprocal(jnp.sum(e, axis=-1, keepdims=True), approx=True)   # softmax(-1)
        ctx = jnp.einsum('hqk,hkd->hqd', attn.astype(bf16), vh,
                         preferred_element_type=f32)                                # (H, S, dh)
        context = jnp.transpose(ctx, (1, 0, 2)).reshape(S, hd)                      # (S, H*dh)

        att = jnp.dot(context.astype(bf16), wo_ref[l], preferred_element_type=f32) + bo_ref[l]
        x1 = _layer_norm(x + att, ln1g_ref[l], ln1b_ref[l], eps)

        # position-wise FFN (Conv1d k=1 == linear)
        h1 = _gelu(jnp.dot(x1.astype(bf16), w1_ref[l], preferred_element_type=f32) + b1_ref[l])
        ffn = jnp.dot(h1.astype(bf16), w2_ref[l], preferred_element_type=f32) + b2_ref[l]
        x = _layer_norm(ffn + x1, ln2g_ref[l], ln2b_ref[l], eps)

    # ---- pooled = x[0] (CLS token) via direct slice, then padded classifier ----
    pooled = x[0:1, :]                                                              # (1, D)
    logits = (jnp.dot(pooled.astype(bf16), clsw_ref[...], preferred_element_type=f32)
              + clsb_ref[...])                                                      # (1, n_out_pad)
    out_ref[0] = logits.astype(out_ref.dtype)


# ------------------------------ parameter init --------------------------------
def init_params(cfg, key):
    keys = iter(jax.random.split(key, 16))
    std = 0.02

    def mat(shape):
        return (std * jax.random.normal(next(keys), shape)).astype(jnp.float32)

    L, D, H, dh, dff = cfg.n_layer, cfg.d_embed, cfg.n_head, cfg.d_head, cfg.d_ff
    hd = H * dh
    scale = 1.0 / (dh ** 0.5)
    bf16, f32 = jnp.bfloat16, jnp.float32

    # stacked [tok; pos; seg] table — bf16 operands, f32 accumulation in kernel
    emb = jnp.concatenate(
        [mat((cfg.n_vocab, D)), mat((cfg.n_seq + 1, D)), mat((2, D))], axis=0
    ).astype(bf16)

    # fused QKV projection; attention scale folded into the Q slice of W and b
    wq, wk, wv = mat((L, D, hd)), mat((L, D, hd)), mat((L, D, hd))
    bq = jnp.zeros((L, 1, hd), f32)
    bk = jnp.zeros((L, 1, hd), f32)
    bv = jnp.zeros((L, 1, hd), f32)
    wqkv = jnp.concatenate([wq * scale, wk, wv], axis=-1).astype(bf16)
    bqkv = jnp.concatenate([bq * scale, bk, bv], axis=-1)

    # lane-dense classifier: pad output dim to a multiple of 128, slice in wrapper
    n_out_pad = ((cfg.n_output + 127) // 128) * 128
    cls_w = (jnp.zeros((D, n_out_pad), f32)
             .at[:, :cfg.n_output].set(mat((D, cfg.n_output)))).astype(bf16)
    cls_b = jnp.zeros((1, n_out_pad), f32)

    return {
        "emb": emb,
        "wqkv": wqkv, "bqkv": bqkv,
        "wo": mat((L, hd, D)).astype(bf16), "bo": jnp.zeros((L, 1, D), f32),
        "ln1_g": jnp.ones((L, 1, D), f32), "ln1_b": jnp.zeros((L, 1, D), f32),
        "w1": mat((L, D, dff)).astype(bf16), "b1": jnp.zeros((L, 1, dff), f32),
        "w2": mat((L, dff, D)).astype(bf16), "b2": jnp.zeros((L, 1, D), f32),
        "ln2_g": jnp.ones((L, 1, D), f32), "ln2_b": jnp.zeros((L, 1, D), f32),
        "cls_w": cls_w, "cls_b": cls_b,
    }


# ------------------------------- forward wrapper -------------------------------
def bert_forward(params, input_ids, token_type_ids):
    cfg = CFG
    B, S = input_ids.shape

    ids = input_ids.astype(jnp.int32)
    segs = token_type_ids.astype(jnp.int32)
    # positions 1..S, 0 at pad tokens (matches reference masked_fill_ semantics)
    pos = jnp.where(ids == cfg.i_pad, 0, jnp.arange(1, S + 1, dtype=jnp.int32)[None, :])
    # fused embedding indices into the stacked [tok; pos; seg] table
    idx = jnp.stack([ids, cfg.n_vocab + pos, cfg.n_vocab + cfg.n_seq + 1 + segs],
                    axis=-1)                                                # (B, S, 3)
    mask_bias = jnp.where(ids == cfg.i_pad, -1.0e9, 0.0).astype(jnp.float32)[:, None, :]  # (B,1,S)

    emb_rows = cfg.n_vocab + cfg.n_seq + 1 + 2
    n_out_pad = params["cls_w"].shape[1]

    kernel = partial(
        bert_forward_kernel,
        S=S, n_layer=cfg.n_layer, n_head=cfg.n_head, d_head=cfg.d_head,
        emb_rows=emb_rows, eps=cfg.layer_norm_epsilon,
    )

    def full2(arr):
        return pl.BlockSpec(arr.shape, lambda b: (0, 0))

    def full3(arr):
        return pl.BlockSpec(arr.shape, lambda b: (0, 0, 0))

    out = pl.pallas_call(
        kernel,
        grid=(B,),
        in_specs=[
            pl.BlockSpec((1, S, 3), lambda b: (b, 0, 0)),   # idx
            pl.BlockSpec((1, 1, S), lambda b: (b, 0, 0)),   # mask_bias
            full2(params["emb"]),
            full3(params["wqkv"]), full3(params["bqkv"]),
            full3(params["wo"]), full3(params["bo"]),
            full3(params["ln1_g"]), full3(params["ln1_b"]),
            full3(params["w1"]), full3(params["b1"]),
            full3(params["w2"]), full3(params["b2"]),
            full3(params["ln2_g"]), full3(params["ln2_b"]),
            full2(params["cls_w"]), full2(params["cls_b"]),
        ],
        out_specs=pl.BlockSpec((1, 1, n_out_pad), lambda b: (b, 0, 0)),
        out_shape=jax.ShapeDtypeStruct((B, 1, n_out_pad), jnp.float32),
        compiler_params=pltpu.CompilerParams(dimension_semantics=("parallel",)),
    )(
        idx, mask_bias, params["emb"],
        params["wqkv"], params["bqkv"], params["wo"], params["bo"],
        params["ln1_g"], params["ln1_b"], params["w1"], params["b1"],
        params["w2"], params["b2"], params["ln2_g"], params["ln2_b"],
        params["cls_w"], params["cls_b"],
    )
    return out.reshape(B, n_out_pad)[:, :cfg.n_output]


# ---------------------------------- main --------------------------------------
if __name__ == "__main__":
    key = jax.random.PRNGKey(0)
    pkey, dkey = jax.random.split(key)
    params = init_params(CFG, pkey)

    B, S = 2, CFG.n_seq
    input_ids = jax.random.randint(dkey, (B, S), 1, CFG.n_vocab, dtype=jnp.int32)
    input_ids = input_ids.at[0, -2:].set(CFG.i_pad)   # some padding to exercise the mask
    token_type_ids = ((jnp.arange(S)[None, :] >= S // 2).astype(jnp.int32)
                      * jnp.ones((B, 1), jnp.int32))

    fwd = jax.jit(bert_forward)
    out = fwd(params, input_ids, token_type_ids)
    jax.block_until_ready(out)
    assert out.shape == (B, CFG.n_output)
    print("KERNEL_OK")
</pallas_src>

<mosaic_0001>
module attributes {stable_mosaic.version = 11 : i64} {
  func.func @bert_forward_kernel(%arg0: i32, %arg1: memref<1x8x3xi32, #tpu.memory_space<vmem>>, %arg2: memref<1x1x8xf32, #tpu.memory_space<vmem>>, %arg3: memref<61x32xbf16, #tpu.memory_space<vmem>>, %arg4: memref<2x32x96xbf16, #tpu.memory_space<vmem>>, %arg5: memref<2x1x96xf32, #tpu.memory_space<vmem>>, %arg6: memref<2x32x32xbf16, #tpu.memory_space<vmem>>, %arg7: memref<2x1x32xf32, #tpu.memory_space<vmem>>, %arg8: memref<2x1x32xf32, #tpu.memory_space<vmem>>, %arg9: memref<2x1x32xf32, #tpu.memory_space<vmem>>, %arg10: memref<2x32x64xbf16, #tpu.memory_space<vmem>>, %arg11: memref<2x1x64xf32, #tpu.memory_space<vmem>>, %arg12: memref<2x64x32xbf16, #tpu.memory_space<vmem>>, %arg13: memref<2x1x32xf32, #tpu.memory_space<vmem>>, %arg14: memref<2x1x32xf32, #tpu.memory_space<vmem>>, %arg15: memref<2x1x32xf32, #tpu.memory_space<vmem>>, %arg16: memref<32x128xbf16, #tpu.memory_space<vmem>>, %arg17: memref<1x128xf32, #tpu.memory_space<vmem>>, %arg18: memref<1x1x128xf32, #tpu.memory_space<vmem>>) attributes {dimension_semantics = [#tpu.dimension_semantics<parallel>], iteration_bounds = array<i64: 2>, scalar_prefetch = 0 : i64, scratch_operands = 0 : i64, tpu.core_type = #tpu.core_type<tc>, window_params = [{transform_indices = @transform_0, window_bounds = array<i64: 1, 8, 3>}, {transform_indices = @transform_1, window_bounds = array<i64: 1, 1, 8>}, {pipeline_mode = #tpu.pipeline_mode<synchronous>, transform_indices = @transform_2, window_bounds = array<i64: 61, 32>}, {pipeline_mode = #tpu.pipeline_mode<synchronous>, transform_indices = @transform_3, window_bounds = array<i64: 2, 32, 96>}, {pipeline_mode = #tpu.pipeline_mode<synchronous>, transform_indices = @transform_4, window_bounds = array<i64: 2, 1, 96>}, {pipeline_mode = #tpu.pipeline_mode<synchronous>, transform_indices = @transform_5, window_bounds = array<i64: 2, 32, 32>}, {pipeline_mode = #tpu.pipeline_mode<synchronous>, transform_indices = @transform_6, window_bounds = array<i64: 2, 1, 32>}, {pipeline_mode = #tpu.pipeline_mode<synchronous>, transform_indices = @transform_7, window_bounds = array<i64: 2, 1, 32>}, {pipeline_mode = #tpu.pipeline_mode<synchronous>, transform_indices = @transform_8, window_bounds = array<i64: 2, 1, 32>}, {pipeline_mode = #tpu.pipeline_mode<synchronous>, transform_indices = @transform_9, window_bounds = array<i64: 2, 32, 64>}, {pipeline_mode = #tpu.pipeline_mode<synchronous>, transform_indices = @transform_10, window_bounds = array<i64: 2, 1, 64>}, {pipeline_mode = #tpu.pipeline_mode<synchronous>, transform_indices = @transform_11, window_bounds = array<i64: 2, 64, 32>}, {pipeline_mode = #tpu.pipeline_mode<synchronous>, transform_indices = @transform_12, window_bounds = array<i64: 2, 1, 32>}, {pipeline_mode = #tpu.pipeline_mode<synchronous>, transform_indices = @transform_13, window_bounds = array<i64: 2, 1, 32>}, {pipeline_mode = #tpu.pipeline_mode<synchronous>, transform_indices = @transform_14, window_bounds = array<i64: 2, 1, 32>}, {pipeline_mode = #tpu.pipeline_mode<synchronous>, transform_indices = @transform_15, window_bounds = array<i64: 32, 128>}, {pipeline_mode = #tpu.pipeline_mode<synchronous>, transform_indices = @transform_16, window_bounds = array<i64: 1, 128>}, {transform_indices = @transform_17, window_bounds = array<i64: 1, 1, 128>}]} {
    %c0 = arith.constant 0 : index
    %c0_0 = arith.constant 0 : index
    %c0_1 = arith.constant 0 : index
    %0 = vector.load %arg1[%c0, %c0_0, %c0_1] : memref<1x8x3xi32, #tpu.memory_space<vmem>>, vector<1x8x3xi32>
    %1 = vector.shape_cast %0 : vector<1x8x3xi32> to vector<8x3xi32>
    %c0_2 = arith.constant 0 : index
    %c0_3 = arith.constant 0 : index
    %c0_4 = arith.constant 0 : index
    %2 = vector.load %arg2[%c0_2, %c0_3, %c0_4] : memref<1x1x8xf32, #tpu.memory_space<vmem>>, vector<1x1x8xf32>
    %3 = vector.shape_cast %2 : vector<1x1x8xf32> to vector<1x8xf32>
    %4 = tpu.iota {dimensions = array<i32: 1>} : vector<8x61xi32>
    %5 = vector.extract_strided_slice %1 {offsets = [0, 0], sizes = [8, 1], strides = [1, 1]} : vector<8x3xi32> to vector<8x1xi32>
    %6 = vector.broadcast %5 : vector<8x1xi32> to vector<8x61xi32>
    %7 = arith.cmpi eq, %4, %6 : vector<8x61xi32>
    %8 = arith.extui %7 : vector<8x61xi1> to vector<8x61xi32>
    %9 = arith.sitofp %8 : vector<8x61xi32> to vector<8x61xf32>
    %10 = vector.extract_strided_slice %1 {offsets = [0, 1], sizes = [8, 1], strides = [1, 1]} : vector<8x3xi32> to vector<8x1xi32>
    %11 = vector.broadcast %10 : vector<8x1xi32> to vector<8x61xi32>
    %12 = arith.cmpi eq, %4, %11 : vector<8x61xi32>
    %13 = arith.extui %12 : vector<8x61xi1> to vector<8x61xi32>
    %14 = arith.sitofp %13 : vector<8x61xi32> to vector<8x61xf32>
    %15 = arith.addf %9, %14 : vector<8x61xf32>
    %16 = vector.extract_strided_slice %1 {offsets = [0, 2], sizes = [8, 1], strides = [1, 1]} : vector<8x3xi32> to vector<8x1xi32>
    %17 = vector.broadcast %16 : vector<8x1xi32> to vector<8x61xi32>
    %18 = arith.cmpi eq, %4, %17 : vector<8x61xi32>
    %19 = arith.extui %18 : vector<8x61xi1> to vector<8x61xi32>
    %20 = arith.sitofp %19 : vector<8x61xi32> to vector<8x61xf32>
    %21 = arith.addf %15, %20 : vector<8x61xf32>
    %22 = arith.truncf %21 : vector<8x61xf32> to vector<8x61xbf16>
    %c0_5 = arith.constant 0 : index
    %c0_6 = arith.constant 0 : index
    %23 = vector.load %arg3[%c0_5, %c0_6] : memref<61x32xbf16, #tpu.memory_space<vmem>>, vector<61x32xbf16>
    %cst = arith.constant dense<0.000000e+00> : vector<8x32xf32>
    %24 = tpu.matmul %22, %23, %cst {dimension_numbers = #tpu.dot_dimension_numbers<[1], [0], [0], [1], [0, 0, 1, 1], [], []>} : vector<8x61xbf16>, vector<61x32xbf16>, vector<8x32xf32> -> vector<8x32xf32>
    %25 = arith.truncf %24 : vector<8x32xf32> to vector<8x32xbf16>
    %c0_7 = arith.constant 0 : index
    %c0_8 = arith.constant 0 : index
    %c0_9 = arith.constant 0 : index
    %26 = vector.load %arg4[%c0_7, %c0_8, %c0_9] : memref<2x32x96xbf16, #tpu.memory_space<vmem>>, vector<1x32x96xbf16>
    %27 = vector.shape_cast %26 : vector<1x32x96xbf16> to vector<32x96xbf16>
    %cst_10 = arith.constant dense<0.000000e+00> : vector<8x96xf32>
    %28 = tpu.matmul %25, %27, %cst_10 {dimension_numbers = #tpu.dot_dimension_numbers<[1], [0], [0], [1], [0, 0, 1, 1], [], []>} : vector<8x32xbf16>, vector<32x96xbf16>, vector<8x96xf32> -> vector<8x96xf32>
    %c0_11 = arith.constant 0 : index
    %c0_12 = arith.constant 0 : index
    %c0_13 = arith.constant 0 : index
    %29 = vector.load %arg5[%c0_11, %c0_12, %c0_13] : memref<2x1x96xf32, #tpu.memory_space<vmem>>, vector<1x1x96xf32>
    %30 = vector.shape_cast %29 : vector<1x1x96xf32> to vector<1x96xf32>
    %31 = vector.broadcast %30 : vector<1x96xf32> to vector<8x96xf32>
    %32 = arith.addf %28, %31 : vector<8x96xf32>
    %33 = vector.extract_strided_slice %32 {offsets = [0, 0], sizes = [8, 32], strides = [1, 1]} : vector<8x96xf32> to vector<8x32xf32>
    %34 = vector.shape_cast %33 : vector<8x32xf32> to vector<8x4x8xf32>
    %35 = tpu.transpose %34, [1, 0, 2] : vector<8x4x8xf32> -> vector<4x8x8xf32>
    %36 = arith.truncf %35 : vector<4x8x8xf32> to vector<4x8x8xbf16>
    %37 = vector.extract_strided_slice %32 {offsets = [0, 32], sizes = [8, 32], strides = [1, 1]} : vector<8x96xf32> to vector<8x32xf32>
    %38 = vector.shape_cast %37 : vector<8x32xf32> to vector<8x4x8xf32>
    %39 = tpu.transpose %38, [1, 0, 2] : vector<8x4x8xf32> -> vector<4x8x8xf32>
    %40 = arith.truncf %39 : vector<4x8x8xf32> to vector<4x8x8xbf16>
    %41 = vector.extract_strided_slice %32 {offsets = [0, 64], sizes = [8, 32], strides = [1, 1]} : vector<8x96xf32> to vector<8x32xf32>
    %42 = vector.shape_cast %41 : vector<8x32xf32> to vector<8x4x8xf32>
    %43 = tpu.transpose %42, [1, 0, 2] : vector<8x4x8xf32> -> vector<4x8x8xf32>
    %44 = arith.truncf %43 : vector<4x8x8xf32> to vector<4x8x8xbf16>
    "tpu.trace_start"() <{level = 10 : i32, message = "hqd,hkd->hqk"}> : () -> ()
    %cst_14 = arith.constant dense<0.000000e+00> : vector<4x8x8xf32>
    %45 = tpu.matmul %36, %40, %cst_14 {dimension_numbers = #tpu.dot_dimension_numbers<[2], [2], [1], [1], [0, 0, 0, 1, 1, 1], [0], [0]>} : vector<4x8x8xbf16>, vector<4x8x8xbf16>, vector<4x8x8xf32> -> vector<4x8x8xf32>
    "tpu.trace_stop"() : () -> ()
    %46 = vector.shape_cast %3 : vector<1x8xf32> to vector<1x1x8xf32>
    %47 = vector.broadcast %46 : vector<1x1x8xf32> to vector<4x8x8xf32>
    %48 = arith.addf %45, %47 : vector<4x8x8xf32>
    %cst_15 = arith.constant dense<0xFF800000> : vector<4x8xf32>
    %49 = vector.multi_reduction <maximumf>, %48, %cst_15 [2] : vector<4x8x8xf32> to vector<4x8xf32>
    %50 = vector.shape_cast %49 : vector<4x8xf32> to vector<4x8x1xf32>
    %51 = vector.broadcast %50 : vector<4x8x1xf32> to vector<4x8x8xf32>
    %52 = arith.subf %48, %51 : vector<4x8x8xf32>
    %53 = math.exp %52 : vector<4x8x8xf32>
    %cst_16 = arith.constant dense<0.000000e+00> : vector<4x8xf32>
    %54 = vector.multi_reduction <add>, %53, %cst_16 [2] : vector<4x8x8xf32> to vector<4x8xf32>
    %55 = vector.shape_cast %54 : vector<4x8xf32> to vector<4x8x1xf32>
    %56 = tpu.reciprocal %55 {approx = true} : vector<4x8x1xf32> -> vector<4x8x1xf32>
    %57 = vector.broadcast %56 : vector<4x8x1xf32> to vector<4x8x8xf32>
    %58 = arith.mulf %53, %57 : vector<4x8x8xf32>
    %59 = arith.truncf %58 : vector<4x8x8xf32> to vector<4x8x8xbf16>
    "tpu.trace_start"() <{level = 10 : i32, message = "hqk,hkd->hqd"}> : () -> ()
    %cst_17 = arith.constant dense<0.000000e+00> : vector<4x8x8xf32>
    %60 = tpu.matmul %59, %44, %cst_17 {dimension_numbers = #tpu.dot_dimension_numbers<[2], [1], [1], [2], [0, 0, 0, 1, 1, 2], [0], [0]>} : vector<4x8x8xbf16>, vector<4x8x8xbf16>, vector<4x8x8xf32> -> vector<4x8x8xf32>
    "tpu.trace_stop"() : () -> ()
    %61 = tpu.transpose %60, [1, 0, 2] : vector<4x8x8xf32> -> vector<8x4x8xf32>
    %62 = vector.shape_cast %61 : vector<8x4x8xf32> to vector<8x32xf32>
    %63 = arith.truncf %62 : vector<8x32xf32> to vector<8x32xbf16>
    %c0_18 = arith.constant 0 : index
    %c0_19 = arith.constant 0 : index
    %c0_20 = arith.constant 0 : index
    %64 = vector.load %arg6[%c0_18, %c0_19, %c0_20] : memref<2x32x32xbf16, #tpu.memory_space<vmem>>, vector<1x32x32xbf16>
    %65 = vector.shape_cast %64 : vector<1x32x32xbf16> to vector<32x32xbf16>
    %cst_21 = arith.constant dense<0.000000e+00> : vector<8x32xf32>
    %66 = tpu.matmul %63, %65, %cst_21 {dimension_numbers = #tpu.dot_dimension_numbers<[1], [0], [0], [1], [0, 0, 1, 1], [], []>} : vector<8x32xbf16>, vector<32x32xbf16>, vector<8x32xf32> -> vector<8x32xf32>
    %c0_22 = arith.constant 0 : index
    %c0_23 = arith.constant 0 : index
    %c0_24 = arith.constant 0 : index
    %67 = vector.load %arg7[%c0_22, %c0_23, %c0_24] : memref<2x1x32xf32, #tpu.memory_space<vmem>>, vector<1x1x32xf32>
    %68 = vector.shape_cast %67 : vector<1x1x32xf32> to vector<1x32xf32>
    %69 = vector.broadcast %68 : vector<1x32xf32> to vector<8x32xf32>
    %70 = arith.addf %66, %69 : vector<8x32xf32>
    %71 = arith.addf %24, %70 : vector<8x32xf32>
    %c0_25 = arith.constant 0 : index
    %c0_26 = arith.constant 0 : index
    %c0_27 = arith.constant 0 : index
    %72 = vector.load %arg8[%c0_25, %c0_26, %c0_27] : memref<2x1x32xf32, #tpu.memory_space<vmem>>, vector<1x1x32xf32>
    %73 = vector.shape_cast %72 : vector<1x1x32xf32> to vector<1x32xf32>
    %c0_28 = arith.constant 0 : index
    %c0_29 = arith.constant 0 : index
    %c0_30 = arith.constant 0 : index
    %74 = vector.load %arg9[%c0_28, %c0_29, %c0_30] : memref<2x1x32xf32, #tpu.memory_space<vmem>>, vector<1x1x32xf32>
    %75 = vector.shape_cast %74 : vector<1x1x32xf32> to vector<1x32xf32>
    %cst_31 = arith.constant dense<0.000000e+00> : vector<8xf32>
    %76 = vector.multi_reduction <add>, %71, %cst_31 [1] : vector<8x32xf32> to vector<8xf32>
    %77 = vector.shape_cast %76 : vector<8xf32> to vector<8x1xf32>
    %cst_32 = arith.constant 3.200000e+01 : f32
    %78 = vector.broadcast %cst_32 : f32 to vector<8x1xf32>
    %79 = arith.divf %77, %78 : vector<8x1xf32>
    %80 = vector.broadcast %79 : vector<8x1xf32> to vector<8x32xf32>
    %81 = arith.subf %71, %80 : vector<8x32xf32>
    %82 = arith.mulf %81, %81 : vector<8x32xf32>
    %cst_33 = arith.constant dense<0.000000e+00> : vector<8xf32>
    %83 = vector.multi_reduction <add>, %82, %cst_33 [1] : vector<8x32xf32> to vector<8xf32>
    %84 = vector.shape_cast %83 : vector<8xf32> to vector<8x1xf32>
    %cst_34 = arith.constant 3.200000e+01 : f32
    %85 = vector.broadcast %cst_34 : f32 to vector<8x1xf32>
    %86 = arith.divf %84, %85 : vector<8x1xf32>
    %87 = vector.broadcast %79 : vector<8x1xf32> to vector<8x32xf32>
    %88 = arith.subf %71, %87 : vector<8x32xf32>
    %cst_35 = arith.constant 9.99999996E-13 : f32
    %89 = vector.broadcast %cst_35 : f32 to vector<8x1xf32>
    %90 = arith.addf %86, %89 : vector<8x1xf32>
    %91 = math.rsqrt %90 : vector<8x1xf32>
    %92 = vector.broadcast %91 : vector<8x1xf32> to vector<8x32xf32>
    %93 = arith.mulf %88, %92 : vector<8x32xf32>
    %94 = vector.broadcast %73 : vector<1x32xf32> to vector<8x32xf32>
    %95 = arith.mulf %93, %94 : vector<8x32xf32>
    %96 = vector.broadcast %75 : vector<1x32xf32> to vector<8x32xf32>
    %97 = arith.addf %95, %96 : vector<8x32xf32>
    %98 = arith.truncf %97 : vector<8x32xf32> to vector<8x32xbf16>
    %c0_36 = arith.constant 0 : index
    %c0_37 = arith.constant 0 : index
    %c0_38 = arith.constant 0 : index
    %99 = vector.load %arg10[%c0_36, %c0_37, %c0_38] : memref<2x32x64xbf16, #tpu.memory_space<vmem>>, vector<1x32x64xbf16>
    %100 = vector.shape_cast %99 : vector<1x32x64xbf16> to vector<32x64xbf16>
    %cst_39 = arith.constant dense<0.000000e+00> : vector<8x64xf32>
    %101 = tpu.matmul %98, %100, %cst_39 {dimension_numbers = #tpu.dot_dimension_numbers<[1], [0], [0], [1], [0, 0, 1, 1], [], []>} : vector<8x32xbf16>, vector<32x64xbf16>, vector<8x64xf32> -> vector<8x64xf32>
    %c0_40 = arith.constant 0 : index
    %c0_41 = arith.constant 0 : index
    %c0_42 = arith.constant 0 : index
    %102 = vector.load %arg11[%c0_40, %c0_41, %c0_42] : memref<2x1x64xf32, #tpu.memory_space<vmem>>, vector<1x1x64xf32>
    %103 = vector.shape_cast %102 : vector<1x1x64xf32> to vector<1x64xf32>
    %104 = vector.broadcast %103 : vector<1x64xf32> to vector<8x64xf32>
    %105 = arith.addf %101, %104 : vector<8x64xf32>
    %cst_43 = arith.constant 5.000000e-01 : f32
    %106 = vector.broadcast %cst_43 : f32 to vector<8x64xf32>
    %107 = arith.mulf %106, %105 : vector<8x64xf32>
    %cst_44 = arith.constant 4.471500e-02 : f32
    %108 = vector.broadcast %cst_44 : f32 to vector<8x64xf32>
    %109 = arith.mulf %108, %105 : vector<8x64xf32>
    %110 = arith.mulf %109, %105 : vector<8x64xf32>
    %111 = arith.mulf %110, %105 : vector<8x64xf32>
    %112 = arith.addf %105, %111 : vector<8x64xf32>
    %cst_45 = arith.constant 0.797884583 : f32
    %113 = vector.broadcast %cst_45 : f32 to vector<8x64xf32>
    %114 = arith.mulf %113, %112 : vector<8x64xf32>
    %115 = math.tanh %114 : vector<8x64xf32>
    %cst_46 = arith.constant 1.000000e+00 : f32
    %116 = vector.broadcast %cst_46 : f32 to vector<8x64xf32>
    %117 = arith.addf %116, %115 : vector<8x64xf32>
    %118 = arith.mulf %107, %117 : vector<8x64xf32>
    %119 = arith.truncf %118 : vector<8x64xf32> to vector<8x64xbf16>
    %c0_47 = arith.constant 0 : index
    %c0_48 = arith.constant 0 : index
    %c0_49 = arith.constant 0 : index
    %120 = vector.load %arg12[%c0_47, %c0_48, %c0_49] : memref<2x64x32xbf16, #tpu.memory_space<vmem>>, vector<1x64x32xbf16>
    %121 = vector.shape_cast %120 : vector<1x64x32xbf16> to vector<64x32xbf16>
    %cst_50 = arith.constant dense<0.000000e+00> : vector<8x32xf32>
    %122 = tpu.matmul %119, %121, %cst_50 {dimension_numbers = #tpu.dot_dimension_numbers<[1], [0], [0], [1], [0, 0, 1, 1], [], []>} : vector<8x64xbf16>, vector<64x32xbf16>, vector<8x32xf32> -> vector<8x32xf32>
    %c0_51 = arith.constant 0 : index
    %c0_52 = arith.constant 0 : index
    %c0_53 = arith.constant 0 : index
    %123 = vector.load %arg13[%c0_51, %c0_52, %c0_53] : memref<2x1x32xf32, #tpu.memory_space<vmem>>, vector<1x1x32xf32>
    %124 = vector.shape_cast %123 : vector<1x1x32xf32> to vector<1x32xf32>
    %125 = vector.broadcast %124 : vector<1x32xf32> to vector<8x32xf32>
    %126 = arith.addf %122, %125 : vector<8x32xf32>
    %127 = arith.addf %126, %97 : vector<8x32xf32>
    %c0_54 = arith.constant 0 : index
    %c0_55 = arith.constant 0 : index
    %c0_56 = arith.constant 0 : index
    %128 = vector.load %arg14[%c0_54, %c0_55, %c0_56] : memref<2x1x32xf32, #tpu.memory_space<vmem>>, vector<1x1x32xf32>
    %129 = vector.shape_cast %128 : vector<1x1x32xf32> to vector<1x32xf32>
    %c0_57 = arith.constant 0 : index
    %c0_58 = arith.constant 0 : index
    %c0_59 = arith.constant 0 : index
    %130 = vector.load %arg15[%c0_57, %c0_58, %c0_59] : memref<2x1x32xf32, #tpu.memory_space<vmem>>, vector<1x1x32xf32>
    %131 = vector.shape_cast %130 : vector<1x1x32xf32> to vector<1x32xf32>
    %cst_60 = arith.constant dense<0.000000e+00> : vector<8xf32>
    %132 = vector.multi_reduction <add>, %127, %cst_60 [1] : vector<8x32xf32> to vector<8xf32>
    %133 = vector.shape_cast %132 : vector<8xf32> to vector<8x1xf32>
    %cst_61 = arith.constant 3.200000e+01 : f32
    %134 = vector.broadcast %cst_61 : f32 to vector<8x1xf32>
    %135 = arith.divf %133, %134 : vector<8x1xf32>
    %136 = vector.broadcast %135 : vector<8x1xf32> to vector<8x32xf32>
    %137 = arith.subf %127, %136 : vector<8x32xf32>
    %138 = arith.mulf %137, %137 : vector<8x32xf32>
    %cst_62 = arith.constant dense<0.000000e+00> : vector<8xf32>
    %139 = vector.multi_reduction <add>, %138, %cst_62 [1] : vector<8x32xf32> to vector<8xf32>
    %140 = vector.shape_cast %139 : vector<8xf32> to vector<8x1xf32>
    %cst_63 = arith.constant 3.200000e+01 : f32
    %141 = vector.broadcast %cst_63 : f32 to vector<8x1xf32>
    %142 = arith.divf %140, %141 : vector<8x1xf32>
    %143 = vector.broadcast %135 : vector<8x1xf32> to vector<8x32xf32>
    %144 = arith.subf %127, %143 : vector<8x32xf32>
    %cst_64 = arith.constant 9.99999996E-13 : f32
    %145 = vector.broadcast %cst_64 : f32 to vector<8x1xf32>
    %146 = arith.addf %142, %145 : vector<8x1xf32>
    %147 = math.rsqrt %146 : vector<8x1xf32>
    %148 = vector.broadcast %147 : vector<8x1xf32> to vector<8x32xf32>
    %149 = arith.mulf %144, %148 : vector<8x32xf32>
    %150 = vector.broadcast %129 : vector<1x32xf32> to vector<8x32xf32>
    %151 = arith.mulf %149, %150 : vector<8x32xf32>
    %152 = vector.broadcast %131 : vector<1x32xf32> to vector<8x32xf32>
    %153 = arith.addf %151, %152 : vector<8x32xf32>
    %154 = arith.truncf %153 : vector<8x32xf32> to vector<8x32xbf16>
    %c1 = arith.constant 1 : index
    %c0_65 = arith.constant 0 : index
    %c0_66 = arith.constant 0 : index
    %155 = vector.load %arg4[%c1, %c0_65, %c0_66] : memref<2x32x96xbf16, #tpu.memory_space<vmem>>, vector<1x32x96xbf16>
    %156 = vector.shape_cast %155 : vector<1x32x96xbf16> to vector<32x96xbf16>
    %cst_67 = arith.constant dense<0.000000e+00> : vector<8x96xf32>
    %157 = tpu.matmul %154, %156, %cst_67 {dimension_numbers = #tpu.dot_dimension_numbers<[1], [0], [0], [1], [0, 0, 1, 1], [], []>} : vector<8x32xbf16>, vector<32x96xbf16>, vector<8x96xf32> -> vector<8x96xf32>
    %c1_68 = arith.constant 1 : index
    %c0_69 = arith.constant 0 : index
    %c0_70 = arith.constant 0 : index
    %158 = vector.load %arg5[%c1_68, %c0_69, %c0_70] : memref<2x1x96xf32, #tpu.memory_space<vmem>>, vector<1x1x96xf32>
    %159 = vector.shape_cast %158 : vector<1x1x96xf32> to vector<1x96xf32>
    %160 = vector.broadcast %159 : vector<1x96xf32> to vector<8x96xf32>
    %161 = arith.addf %157, %160 : vector<8x96xf32>
    %162 = vector.extract_strided_slice %161 {offsets = [0, 0], sizes = [8, 32], strides = [1, 1]} : vector<8x96xf32> to vector<8x32xf32>
    %163 = vector.shape_cast %162 : vector<8x32xf32> to vector<8x4x8xf32>
    %164 = tpu.transpose %163, [1, 0, 2] : vector<8x4x8xf32> -> vector<4x8x8xf32>
    %165 = arith.truncf %164 : vector<4x8x8xf32> to vector<4x8x8xbf16>
    %166 = vector.extract_strided_slice %161 {offsets = [0, 32], sizes = [8, 32], strides = [1, 1]} : vector<8x96xf32> to vector<8x32xf32>
    %167 = vector.shape_cast %166 : vector<8x32xf32> to vector<8x4x8xf32>
    %168 = tpu.transpose %167, [1, 0, 2] : vector<8x4x8xf32> -> vector<4x8x8xf32>
    %169 = arith.truncf %168 : vector<4x8x8xf32> to vector<4x8x8xbf16>
    %170 = vector.extract_strided_slice %161 {offsets = [0, 64], sizes = [8, 32], strides = [1, 1]} : vector<8x96xf32> to vector<8x32xf32>
    %171 = vector.shape_cast %170 : vector<8x32xf32> to vector<8x4x8xf32>
    %172 = tpu.transpose %171, [1, 0, 2] : vector<8x4x8xf32> -> vector<4x8x8xf32>
    %173 = arith.truncf %172 : vector<4x8x8xf32> to vector<4x8x8xbf16>
    "tpu.trace_start"() <{level = 10 : i32, message = "hqd,hkd->hqk"}> : () -> ()
    %cst_71 = arith.constant dense<0.000000e+00> : vector<4x8x8xf32>
    %174 = tpu.matmul %165, %169, %cst_71 {dimension_numbers = #tpu.dot_dimension_numbers<[2], [2], [1], [1], [0, 0, 0, 1, 1, 1], [0], [0]>} : vector<4x8x8xbf16>, vector<4x8x8xbf16>, vector<4x8x8xf32> -> vector<4x8x8xf32>
    "tpu.trace_stop"() : () -> ()
    %175 = vector.shape_cast %3 : vector<1x8xf32> to vector<1x1x8xf32>
    %176 = vector.broadcast %175 : vector<1x1x8xf32> to vector<4x8x8xf32>
    %177 = arith.addf %174, %176 : vector<4x8x8xf32>
    %cst_72 = arith.constant dense<0xFF800000> : vector<4x8xf32>
    %178 = vector.multi_reduction <maximumf>, %177, %cst_72 [2] : vector<4x8x8xf32> to vector<4x8xf32>
    %179 = vector.shape_cast %178 : vector<4x8xf32> to vector<4x8x1xf32>
    %180 = vector.broadcast %179 : vector<4x8x1xf32> to vector<4x8x8xf32>
    %181 = arith.subf %177, %180 : vector<4x8x8xf32>
    %182 = math.exp %181 : vector<4x8x8xf32>
    %cst_73 = arith.constant dense<0.000000e+00> : vector<4x8xf32>
    %183 = vector.multi_reduction <add>, %182, %cst_73 [2] : vector<4x8x8xf32> to vector<4x8xf32>
    %184 = vector.shape_cast %183 : vector<4x8xf32> to vector<4x8x1xf32>
    %185 = tpu.reciprocal %184 {approx = true} : vector<4x8x1xf32> -> vector<4x8x1xf32>
    %186 = vector.broadcast %185 : vector<4x8x1xf32> to vector<4x8x8xf32>
    %187 = arith.mulf %182, %186 : vector<4x8x8xf32>
    %188 = arith.truncf %187 : vector<4x8x8xf32> to vector<4x8x8xbf16>
    "tpu.trace_start"() <{level = 10 : i32, message = "hqk,hkd->hqd"}> : () -> ()
    %cst_74 = arith.constant dense<0.000000e+00> : vector<4x8x8xf32>
    %189 = tpu.matmul %188, %173, %cst_74 {dimension_numbers = #tpu.dot_dimension_numbers<[2], [1], [1], [2], [0, 0, 0, 1, 1, 2], [0], [0]>} : vector<4x8x8xbf16>, vector<4x8x8xbf16>, vector<4x8x8xf32> -> vector<4x8x8xf32>
    "tpu.trace_stop"() : () -> ()
    %190 = tpu.transpose %189, [1, 0, 2] : vector<4x8x8xf32> -> vector<8x4x8xf32>
    %191 = vector.shape_cast %190 : vector<8x4x8xf32> to vector<8x32xf32>
    %192 = arith.truncf %191 : vector<8x32xf32> to vector<8x32xbf16>
    %c1_75 = arith.constant 1 : index
    %c0_76 = arith.constant 0 : index
    %c0_77 = arith.constant 0 : index
    %193 = vector.load %arg6[%c1_75, %c0_76, %c0_77] : memref<2x32x32xbf16, #tpu.memory_space<vmem>>, vector<1x32x32xbf16>
    %194 = vector.shape_cast %193 : vector<1x32x32xbf16> to vector<32x32xbf16>
    %cst_78 = arith.constant dense<0.000000e+00> : vector<8x32xf32>
    %195 = tpu.matmul %192, %194, %cst_78 {dimension_numbers = #tpu.dot_dimension_numbers<[1], [0], [0], [1], [0, 0, 1, 1], [], []>} : vector<8x32xbf16>, vector<32x32xbf16>, vector<8x32xf32> -> vector<8x32xf32>
    %c1_79 = arith.constant 1 : index
    %c0_80 = arith.constant 0 : index
    %c0_81 = arith.constant 0 : index
    %196 = vector.load %arg7[%c1_79, %c0_80, %c0_81] : memref<2x1x32xf32, #tpu.memory_space<vmem>>, vector<1x1x32xf32>
    %197 = vector.shape_cast %196 : vector<1x1x32xf32> to vector<1x32xf32>
    %198 = vector.broadcast %197 : vector<1x32xf32> to vector<8x32xf32>
    %199 = arith.addf %195, %198 : vector<8x32xf32>
    %200 = arith.addf %153, %199 : vector<8x32xf32>
    %c1_82 = arith.constant 1 : index
    %c0_83 = arith.constant 0 : index
    %c0_84 = arith.constant 0 : index
    %201 = vector.load %arg8[%c1_82, %c0_83, %c0_84] : memref<2x1x32xf32, #tpu.memory_space<vmem>>, vector<1x1x32xf32>
    %202 = vector.shape_cast %201 : vector<1x1x32xf32> to vector<1x32xf32>
    %c1_85 = arith.constant 1 : index
    %c0_86 = arith.constant 0 : index
    %c0_87 = arith.constant 0 : index
    %203 = vector.load %arg9[%c1_85, %c0_86, %c0_87] : memref<2x1x32xf32, #tpu.memory_space<vmem>>, vector<1x1x32xf32>
    %204 = vector.shape_cast %203 : vector<1x1x32xf32> to vector<1x32xf32>
    %cst_88 = arith.constant dense<0.000000e+00> : vector<8xf32>
    %205 = vector.multi_reduction <add>, %200, %cst_88 [1] : vector<8x32xf32> to vector<8xf32>
    %206 = vector.shape_cast %205 : vector<8xf32> to vector<8x1xf32>
    %cst_89 = arith.constant 3.200000e+01 : f32
    %207 = vector.broadcast %cst_89 : f32 to vector<8x1xf32>
    %208 = arith.divf %206, %207 : vector<8x1xf32>
    %209 = vector.broadcast %208 : vector<8x1xf32> to vector<8x32xf32>
    %210 = arith.subf %200, %209 : vector<8x32xf32>
    %211 = arith.mulf %210, %210 : vector<8x32xf32>
    %cst_90 = arith.constant dense<0.000000e+00> : vector<8xf32>
    %212 = vector.multi_reduction <add>, %211, %cst_90 [1] : vector<8x32xf32> to vector<8xf32>
    %213 = vector.shape_cast %212 : vector<8xf32> to vector<8x1xf32>
    %cst_91 = arith.constant 3.200000e+01 : f32
    %214 = vector.broadcast %cst_91 : f32 to vector<8x1xf32>
    %215 = arith.divf %213, %214 : vector<8x1xf32>
    %216 = vector.broadcast %208 : vector<8x1xf32> to vector<8x32xf32>
    %217 = arith.subf %200, %216 : vector<8x32xf32>
    %cst_92 = arith.constant 9.99999996E-13 : f32
    %218 = vector.broadcast %cst_92 : f32 to vector<8x1xf32>
    %219 = arith.addf %215, %218 : vector<8x1xf32>
    %220 = math.rsqrt %219 : vector<8x1xf32>
    %221 = vector.broadcast %220 : vector<8x1xf32> to vector<8x32xf32>
    %222 = arith.mulf %217, %221 : vector<8x32xf32>
    %223 = vector.broadcast %202 : vector<1x32xf32> to vector<8x32xf32>
    %224 = arith.mulf %222, %223 : vector<8x32xf32>
    %225 = vector.broadcast %204 : vector<1x32xf32> to vector<8x32xf32>
    %226 = arith.addf %224, %225 : vector<8x32xf32>
    %227 = arith.truncf %226 : vector<8x32xf32> to vector<8x32xbf16>
    %c1_93 = arith.constant 1 : index
    %c0_94 = arith.constant 0 : index
    %c0_95 = arith.constant 0 : index
    %228 = vector.load %arg10[%c1_93, %c0_94, %c0_95] : memref<2x32x64xbf16, #tpu.memory_space<vmem>>, vector<1x32x64xbf16>
    %229 = vector.shape_cast %228 : vector<1x32x64xbf16> to vector<32x64xbf16>
    %cst_96 = arith.constant dense<0.000000e+00> : vector<8x64xf32>
    %230 = tpu.matmul %227, %229, %cst_96 {dimension_numbers = #tpu.dot_dimension_numbers<[1], [0], [0], [1], [0, 0, 1, 1], [], []>} : vector<8x32xbf16>, vector<32x64xbf16>, vector<8x64xf32> -> vector<8x64xf32>
    %c1_97 = arith.constant 1 : index
    %c0_98 = arith.constant 0 : index
    %c0_99 = arith.constant 0 : index
    %231 = vector.load %arg11[%c1_97, %c0_98, %c0_99] : memref<2x1x64xf32, #tpu.memory_space<vmem>>, vector<1x1x64xf32>
    %232 = vector.shape_cast %231 : vector<1x1x64xf32> to vector<1x64xf32>
    %233 = vector.broadcast %232 : vector<1x64xf32> to vector<8x64xf32>
    %234 = arith.addf %230, %233 : vector<8x64xf32>
    %cst_100 = arith.constant 5.000000e-01 : f32
    %235 = vector.broadcast %cst_100 : f32 to vector<8x64xf32>
    %236 = arith.mulf %235, %234 : vector<8x64xf32>
    %cst_101 = arith.constant 4.471500e-02 : f32
    %237 = vector.broadcast %cst_101 : f32 to vector<8x64xf32>
    %238 = arith.mulf %237, %234 : vector<8x64xf32>
    %239 = arith.mulf %238, %234 : vector<8x64xf32>
    %240 = arith.mulf %239, %234 : vector<8x64xf32>
    %241 = arith.addf %234, %240 : vector<8x64xf32>
    %cst_102 = arith.constant 0.797884583 : f32
    %242 = vector.broadcast %cst_102 : f32 to vector<8x64xf32>
    %243 = arith.mulf %242, %241 : vector<8x64xf32>
    %244 = math.tanh %243 : vector<8x64xf32>
    %cst_103 = arith.constant 1.000000e+00 : f32
    %245 = vector.broadcast %cst_103 : f32 to vector<8x64xf32>
    %246 = arith.addf %245, %244 : vector<8x64xf32>
    %247 = arith.mulf %236, %246 : vector<8x64xf32>
    %248 = arith.truncf %247 : vector<8x64xf32> to vector<8x64xbf16>
    %c1_104 = arith.constant 1 : index
    %c0_105 = arith.constant 0 : index
    %c0_106 = arith.constant 0 : index
    %249 = vector.load %arg12[%c1_104, %c0_105, %c0_106] : memref<2x64x32xbf16, #tpu.memory_space<vmem>>, vector<1x64x32xbf16>
    %250 = vector.shape_cast %249 : vector<1x64x32xbf16> to vector<64x32xbf16>
    %cst_107 = arith.constant dense<0.000000e+00> : vector<8x32xf32>
    %251 = tpu.matmul %248, %250, %cst_107 {dimension_numbers = #tpu.dot_dimension_numbers<[1], [0], [0], [1], [0, 0, 1, 1], [], []>} : vector<8x64xbf16>, vector<64x32xbf16>, vector<8x32xf32> -> vector<8x32xf32>
    %c1_108 = arith.constant 1 : index
    %c0_109 = arith.constant 0 : index
    %c0_110 = arith.constant 0 : index
    %252 = vector.load %arg13[%c1_108, %c0_109, %c0_110] : memref<2x1x32xf32, #tpu.memory_space<vmem>>, vector<1x1x32xf32>
    %253 = vector.shape_cast %252 : vector<1x1x32xf32> to vector<1x32xf32>
    %254 = vector.broadcast %253 : vector<1x32xf32> to vector<8x32xf32>
    %255 = arith.addf %251, %254 : vector<8x32xf32>
    %256 = arith.addf %255, %226 : vector<8x32xf32>
    %c1_111 = arith.constant 1 : index
    %c0_112 = arith.constant 0 : index
    %c0_113 = arith.constant 0 : index
    %257 = vector.load %arg14[%c1_111, %c0_112, %c0_113] : memref<2x1x32xf32, #tpu.memory_space<vmem>>, vector<1x1x32xf32>
    %258 = vector.shape_cast %257 : vector<1x1x32xf32> to vector<1x32xf32>
    %c1_114 = arith.constant 1 : index
    %c0_115 = arith.constant 0 : index
    %c0_116 = arith.constant 0 : index
    %259 = vector.load %arg15[%c1_114, %c0_115, %c0_116] : memref<2x1x32xf32, #tpu.memory_space<vmem>>, vector<1x1x32xf32>
    %260 = vector.shape_cast %259 : vector<1x1x32xf32> to vector<1x32xf32>
    %cst_117 = arith.constant dense<0.000000e+00> : vector<8xf32>
    %261 = vector.multi_reduction <add>, %256, %cst_117 [1] : vector<8x32xf32> to vector<8xf32>
    %262 = vector.shape_cast %261 : vector<8xf32> to vector<8x1xf32>
    %cst_118 = arith.constant 3.200000e+01 : f32
    %263 = vector.broadcast %cst_118 : f32 to vector<8x1xf32>
    %264 = arith.divf %262, %263 : vector<8x1xf32>
    %265 = vector.broadcast %264 : vector<8x1xf32> to vector<8x32xf32>
    %266 = arith.subf %256, %265 : vector<8x32xf32>
    %267 = arith.mulf %266, %266 : vector<8x32xf32>
    %cst_119 = arith.constant dense<0.000000e+00> : vector<8xf32>
    %268 = vector.multi_reduction <add>, %267, %cst_119 [1] : vector<8x32xf32> to vector<8xf32>
    %269 = vector.shape_cast %268 : vector<8xf32> to vector<8x1xf32>
    %cst_120 = arith.constant 3.200000e+01 : f32
    %270 = vector.broadcast %cst_120 : f32 to vector<8x1xf32>
    %271 = arith.divf %269, %270 : vector<8x1xf32>
    %272 = vector.broadcast %264 : vector<8x1xf32> to vector<8x32xf32>
    %273 = arith.subf %256, %272 : vector<8x32xf32>
    %cst_121 = arith.constant 9.99999996E-13 : f32
    %274 = vector.broadcast %cst_121 : f32 to vector<8x1xf32>
    %275 = arith.addf %271, %274 : vector<8x1xf32>
    %276 = math.rsqrt %275 : vector<8x1xf32>
    %277 = vector.broadcast %276 : vector<8x1xf32> to vector<8x32xf32>
    %278 = arith.mulf %273, %277 : vector<8x32xf32>
    %279 = vector.broadcast %258 : vector<1x32xf32> to vector<8x32xf32>
    %280 = arith.mulf %278, %279 : vector<8x32xf32>
    %281 = vector.broadcast %260 : vector<1x32xf32> to vector<8x32xf32>
    %282 = arith.addf %280, %281 : vector<8x32xf32>
    %283 = vector.extract_strided_slice %282 {offsets = [0, 0], sizes = [1, 32], strides = [1, 1]} : vector<8x32xf32> to vector<1x32xf32>
    %284 = arith.truncf %283 : vector<1x32xf32> to vector<1x32xbf16>
    %c0_122 = arith.constant 0 : index
    %c0_123 = arith.constant 0 : index
    %285 = vector.load %arg16[%c0_122, %c0_123] : memref<32x128xbf16, #tpu.memory_space<vmem>>, vector<32x128xbf16>
    %cst_124 = arith.constant dense<0.000000e+00> : vector<1x128xf32>
    %286 = tpu.matmul %284, %285, %cst_124 {dimension_numbers = #tpu.dot_dimension_numbers<[1], [0], [0], [1], [0, 0, 1, 1], [], []>} : vector<1x32xbf16>, vector<32x128xbf16>, vector<1x128xf32> -> vector<1x128xf32>
    %c0_125 = arith.constant 0 : index
    %c0_126 = arith.constant 0 : index
    %287 = vector.load %arg17[%c0_125, %c0_126] : memref<1x128xf32, #tpu.memory_space<vmem>>, vector<1x128xf32>
    %288 = arith.addf %286, %287 : vector<1x128xf32>
    %c0_127 = arith.constant 0 : index
    %c0_128 = arith.constant 0 : index
    %c0_129 = arith.constant 0 : index
    %289 = vector.load %arg18[%c0_127, %c0_128, %c0_129] : memref<1x1x128xf32, #tpu.memory_space<vmem>>, vector<1x1x128xf32>
    %290 = vector.shape_cast %289 : vector<1x1x128xf32> to vector<1x128xf32>
    %291 = vector.shape_cast %288 : vector<1x128xf32> to vector<1x1x128xf32>
    tpu.vector_store %arg18[%c0_127, %c0_128, %c0_129], %291 {strides = array<i32>} : memref<1x1x128xf32, #tpu.memory_space<vmem>>, vector<1x1x128xf32>,
    return
  }
  func.func @transform_0(%arg0: i32) -> (i32, i32, i32) {
    %c0_i32 = arith.constant 0 : i32
    %c0_i32_0 = arith.constant 0 : i32
    %c0_i32_1 = arith.constant 0 : i32
    return %arg0, %c0_i32, %c0_i32_0 : i32, i32, i32
  }
  func.func @transform_1(%arg0: i32) -> (i32, i32, i32) {
    %c0_i32 = arith.constant 0 : i32
    %c0_i32_0 = arith.constant 0 : i32
    %c0_i32_1 = arith.constant 0 : i32
    return %arg0, %c0_i32, %c0_i32_0 : i32, i32, i32
  }
  func.func @transform_2(%arg0: i32) -> (i32, i32) {
    %c0_i32 = arith.constant 0 : i32
    %c0_i32_0 = arith.constant 0 : i32
    %c0_i32_1 = arith.constant 0 : i32
    return %c0_i32, %c0_i32_0 : i32, i32
  }
  func.func @transform_3(%arg0: i32) -> (i32, i32, i32) {
    %c0_i32 = arith.constant 0 : i32
    %c0_i32_0 = arith.constant 0 : i32
    %c0_i32_1 = arith.constant 0 : i32
    %c0_i32_2 = arith.constant 0 : i32
    return %c0_i32, %c0_i32_0, %c0_i32_1 : i32, i32, i32
  }
  func.func @transform_4(%arg0: i32) -> (i32, i32, i32) {
    %c0_i32 = arith.constant 0 : i32
    %c0_i32_0 = arith.constant 0 : i32
    %c0_i32_1 = arith.constant 0 : i32
    %c0_i32_2 = arith.constant 0 : i32
    return %c0_i32, %c0_i32_0, %c0_i32_1 : i32, i32, i32
  }
  func.func @transform_5(%arg0: i32) -> (i32, i32, i32) {
    %c0_i32 = arith.constant 0 : i32
    %c0_i32_0 = arith.constant 0 : i32
    %c0_i32_1 = arith.constant 0 : i32
    %c0_i32_2 = arith.constant 0 : i32
    return %c0_i32, %c0_i32_0, %c0_i32_1 : i32, i32, i32
  }
  func.func @transform_6(%arg0: i32) -> (i32, i32, i32) {
    %c0_i32 = arith.constant 0 : i32
    %c0_i32_0 = arith.constant 0 : i32
    %c0_i32_1 = arith.constant 0 : i32
    %c0_i32_2 = arith.constant 0 : i32
    return %c0_i32, %c0_i32_0, %c0_i32_1 : i32, i32, i32
  }
  func.func @transform_7(%arg0: i32) -> (i32, i32, i32) {
    %c0_i32 = arith.constant 0 : i32
    %c0_i32_0 = arith.constant 0 : i32
    %c0_i32_1 = arith.constant 0 : i32
    %c0_i32_2 = arith.constant 0 : i32
    return %c0_i32, %c0_i32_0, %c0_i32_1 : i32, i32, i32
  }
  func.func @transform_8(%arg0: i32) -> (i32, i32, i32) {
    %c0_i32 = arith.constant 0 : i32
    %c0_i32_0 = arith.constant 0 : i32
    %c0_i32_1 = arith.constant 0 : i32
    %c0_i32_2 = arith.constant 0 : i32
    return %c0_i32, %c0_i32_0, %c0_i32_1 : i32, i32, i32
  }
  func.func @transform_9(%arg0: i32) -> (i32, i32, i32) {
    %c0_i32 = arith.constant 0 : i32
    %c0_i32_0 = arith.constant 0 : i32
    %c0_i32_1 = arith.constant 0 : i32
    %c0_i32_2 = arith.constant 0 : i32
    return %c0_i32, %c0_i32_0, %c0_i32_1 : i32, i32, i32
  }
  func.func @transform_10(%arg0: i32) -> (i32, i32, i32) {
    %c0_i32 = arith.constant 0 : i32
    %c0_i32_0 = arith.constant 0 : i32
    %c0_i32_1 = arith.constant 0 : i32
    %c0_i32_2 = arith.constant 0 : i32
    return %c0_i32, %c0_i32_0, %c0_i32_1 : i32, i32, i32
  }
  func.func @transform_11(%arg0: i32) -> (i32, i32, i32) {
    %c0_i32 = arith.constant 0 : i32
    %c0_i32_0 = arith.constant 0 : i32
    %c0_i32_1 = arith.constant 0 : i32
    %c0_i32_2 = arith.constant 0 : i32
    return %c0_i32, %c0_i32_0, %c0_i32_1 : i32, i32, i32
  }
  func.func @transform_12(%arg0: i32) -> (i32, i32, i32) {
    %c0_i32 = arith.constant 0 : i32
    %c0_i32_0 = arith.constant 0 : i32
    %c0_i32_1 = arith.constant 0 : i32
    %c0_i32_2 = arith.constant 0 : i32
    return %c0_i32, %c0_i32_0, %c0_i32_1 : i32, i32, i32
  }
  func.func @transform_13(%arg0: i32) -> (i32, i32, i32) {
    %c0_i32 = arith.constant 0 : i32
    %c0_i32_0 = arith.constant 0 : i32
    %c0_i32_1 = arith.constant 0 : i32
    %c0_i32_2 = arith.constant 0 : i32
    return %c0_i32, %c0_i32_0, %c0_i32_1 : i32, i32, i32
  }
  func.func @transform_14(%arg0: i32) -> (i32, i32, i32) {
    %c0_i32 = arith.constant 0 : i32
    %c0_i32_0 = arith.constant 0 : i32
    %c0_i32_1 = arith.constant 0 : i32
    %c0_i32_2 = arith.constant 0 : i32
    return %c0_i32, %c0_i32_0, %c0_i32_1 : i32, i32, i32
  }
  func.func @transform_15(%arg0: i32) -> (i32, i32) {
    %c0_i32 = arith.constant 0 : i32
    %c0_i32_0 = arith.constant 0 : i32
    %c0_i32_1 = arith.constant 0 : i32
    return %c0_i32, %c0_i32_0 : i32, i32
  }
  func.func @transform_16(%arg0: i32) -> (i32, i32) {
    %c0_i32 = arith.constant 0 : i32
    %c0_i32_0 = arith.constant 0 : i32
    %c0_i32_1 = arith.constant 0 : i32
    return %c0_i32, %c0_i32_0 : i32, i32
  }
  func.func @transform_17(%arg0: i32) -> (i32, i32, i32) {
    %c0_i32 = arith.constant 0 : i32
    %c0_i32_0 = arith.constant 0 : i32
    %c0_i32_1 = arith.constant 0 : i32
    return %arg0, %c0_i32, %c0_i32_0 : i32, i32, i32
  }
}

</mosaic_0001>

<bundles_post_ra>
// kernel: bert_forward.1
= control target key start
LH: loop header
LB: loop body
LE: loop exit
PB: predicated region body
PF: predicated region fallthrough
CT: control target
= control target key end

     0   :  { %s3893_s0 = inlined_call_operand.vmem [shape: s32[2,8,3], index: 0, kind: input, shape index: {}]   ;;  %s3894_s1 = inlined_call_operand.vmem [shape: f32[2,1,8], index: 1, kind: input, shape index: {}]   ;;  %s3895_s2 = inlined_call_operand.vmem [shape: bf16[61,32], index: 2, kind: input, shape index: {}]   ;;  %s3896_s3 = inlined_call_operand.vmem [shape: bf16[2,32,96], index: 3, kind: input, shape index: {}]   ;;  %s3897_s4 = inlined_call_operand.vmem [shape: f32[2,1,96], index: 4, kind: input, shape index: {}]   ;;  %s3898_s5 = inlined_call_operand.vmem [shape: bf16[2,32,32], index: 5, kind: input, shape index: {}]   ;;  %s3899_s6 = inlined_call_operand.vmem [shape: f32[2,1,32], index: 6, kind: input, shape index: {}]   ;;  %s3900_s7 = inlined_call_operand.vmem [shape: f32[2,1,32], index: 7, kind: input, shape index: {}]   ;;  %s3901_s8 = inlined_call_operand.vmem [shape: f32[2,1,32], index: 8, kind: input, shape index: {}]   ;;  %s3902_s9 = inlined_call_operand.vmem [shape: bf16[2,32,64], index: 9, kind: input, shape index: {}]   ;;  %s3903_s10 = inlined_call_operand.vmem [shape: f32[2,1,64], index: 10, kind: input, shape index: {}]   ;;  %s3904_s11 = inlined_call_operand.vmem [shape: bf16[2,64,32], index: 11, kind: input, shape index: {}]   ;;  %s3905_s12 = inlined_call_operand.vmem [shape: f32[2,1,32], index: 12, kind: input, shape index: {}]   ;;  %s3906_s13 = inlined_call_operand.vmem [shape: f32[2,1,32], index: 13, kind: input, shape index: {}]   ;;  %s3907_s14 = inlined_call_operand.vmem [shape: f32[2,1,32], index: 14, kind: input, shape index: {}]   ;;  %s3908_s15 = inlined_call_operand.vmem [shape: bf16[32,128], index: 15, kind: input, shape index: {}]   ;;  %s3909_s16 = inlined_call_operand.vmem [shape: f32[1,128], index: 16, kind: input, shape index: {}]   ;;  %s3910_s17 = inlined_call_operand.hbm [shape: f32[2,1,128], index: 17, kind: output, shape index: {}]  }
   0x1   :  { %3926 = sst [smem:[#allocation12_spill]] %s3893_s0 }
   0x2   :  { %3927 = sst [smem:[#allocation13_spill]] %s3894_s1 }
   0x3   :  { %3928 = sst [smem:[#allocation14_spill]] %s3909_s16 }
   0x4   :  { %22 = vsyncpa [#allocation3], 0 }
   0x5   :  { %24 = vsyncpa [#allocation3 + $0x1], 0  ;;  %s3186_s24 = smov 0   ;;  %s3188_s25 = smov 0  }
   0x6   :  { %s3190_s26 = smov 0   ;;  %s3192_s27 = smov 0  }
   0x7 LB: > { %3929 = sst [smem:[#allocation5_spill]] %s3066_s24  ;;  %s3207_s28 = sadd.s32 4294967295, %s3078_s27   ;;  %s3078_s27 = sphi %s3192_s27, %s3950_s27   ;;  %s3074_s26 = sphi %s3190_s26, %s3952_s26   ;;  %s3070_s25 = sphi %s3188_s25, %s3954_s25   ;;  %s3066_s24 = sphi %s3186_s24, %s3953_s24  }
   0x8   : > { %3930 = sst [smem:[#allocation6_spill]] %s3074_s26  ;;  %s2659_s29 = sadd.s32 4294967294, %s3078_s27  }
   0x9   : > { %3931 = sst [smem:[#allocation7_spill]] %s3078_s27  ;;  %s3211_s0 = sadd.s32 1, %s3078_s27  }
   0xa   : > { %3932 = sst [smem:[#allocation8_spill]] %s3211_s0  ;;  %s404_s30 = sadd.s32 1, %s3074_s26 }
   0xb   : > { %s401_s18 = ssub.s32 %s3078_s27, %s3211_s0  ;;  %p414_p0 = scmp.ne.s32.totalorder %s3074_s26, %s3070_s25 }
   0xc   : > { %p402_p1 = scmp.eq.s32.totalorder %s401_s18, 0  ;;  %p415_p2 = scmp.eq.s32.totalorder %s3207_s28, 1 }
   0xd   : > { %p420_p3 = scmp.ne.s32.totalorder %s3070_s25, %s3066_s24  ;;  %p421_p4 = scmp.eq.s32.totalorder %s2659_s29, 1 }
   0xe   : > { %s3222_s19 = scalar_select %p402_p1, %s3074_s26, %s404_s30  }
   0xf   : > { %p3224_p5 = por %p415_p2, %p414_p0  ;;  %p3228_p6 = por %p421_p4, %p420_p3 }
  0x10   : > { %3933 = sst [smem:[#allocation9_spill]] %s3222_s19  ;;  %p2662_p7 = scmp.ge.s32.totalorder %s3078_s27, 1 }
  0x11   : > { %s3934_s1 = scalar_select %p3224_p5, 1, 0 }
  0x12   : > { %s3936_s20 = scalar_select %p3228_p6, 1, 0 }
  0x13   : > { %3935 = sst [smem:[#allocation10_spill]] %s3934_s1  ;;  %p497_p8 = scmp.lt.s32.totalorder %s3078_s27, 3 }
  0x14   : > { %3937 = sst [smem:[#allocation11_spill]] %s3936_s20 }
  0x15   : > { %p498_p9 = pnand %p2662_p7, %p497_p8 }
  0x16   : > { %p550_p10 = scmp.lt.s32.totalorder (!%p498_p9), %s3207_s28, 1  ;;  %s3938_s30 = sld [smem:[#allocation13_spill]] (!%p498_p9) }
  0x17   : > { %501 = sbr.rel (%p498_p9) target bundleno = 4528 (0x11b0), region = 88  ;;  %s3939_s0 = sld [smem:[#allocation12_spill]] (!%p498_p9) }
  0x18   : > { %s3086_s26 = smov (!%p498_p9), 120   ;;  %s3924_s19 = smov (!%p498_p9), 96  }
  0x19   : > { %s3922_s24 = smov (!%p498_p9), 64   ;;  %s3921_s16 = smov (!%p498_p9), 16  }
  0x1a   : > { %s3920_s27 = smov (!%p498_p9), 8   ;;  %s3919_s1 = smov (!%p498_p9), 24  }
  0x1b   : > { %s548_s23 = sand.u32 (!%p498_p9), 1, %s3070_s25  }
  0x1c   : > { %v3080_v0 = vmov 0   ;;  %v3081_v1 = vmov 2   ;;  %s551_s21 = scalar_select %p550_p10, %s3207_s28, 1  ;;  %v3082_v3 = vmov 1   ;;  %v2681_v4 = vld [vmem:[%s3895_s2 + $0x18] sm:$0xf]  ;;  %v560_v15 = vlaneseq }
  0x1d   : > { %2908 = vset.pattern.permute.xlu0 %v3080_v0  ;;  %2910 = vset.pattern.permute.xlu1 %v3081_v1  ;;  %v2830_v5 = vld [vmem:[%s3895_s2 + $0x18] sm:$0x70]  ;;  %vm618_vm0 = vcmask 1045504   ;;  %vm619_vm1 = vcmask 1046528   ;;  %v3083_v7 = vmov 65535   ;;  %v2829_v11 = vld [vmem:[%s3895_s2 + $0x10] sm:$0xff] }
  0x1e   : > { %s2663_s22 = sshll.u32 %s551_s21, 3  ;;  %s3239_s18 = scalar_lea.vmem %s3938_s30, %s551_s21  ;;  %v2682_v6 = vor.u32 %v2830_v5, %v2681_v4  ;;  %v620_v8 = vsel %vm618_vm0, 4294967295, %v3083_v7  ;;  %v2828_v12 = vld [vmem:[%s3895_s2 + $0x8] sm:$0xff]  ;;  %v2827_v13 = vld [vmem:[%s3895_s2] sm:$0xff]  ;;  %v561_v17 = vand.u32 127, %v560_v15  ;;  %v3084_v20 = vmov 0.0  }
  0x1f   : > { %s553_s20 = scalar_lea.vmem %s3939_s0, %s2663_s22  ;;  %v621_v9 = vsel %vm619_vm1, %v620_v8, 0  ;;  %v2832_v14 = vld [vmem:[%s3896_s3 + $0x8] sm:$0xff]  ;;  %vm614_vm5 = vcmask 498688   ;;  %v2831_v27 = vld [vmem:[%s3896_s3] sm:$0xff]  ;;  %vm659_vm6 = vcmask 261120   ;;  %s3085_s30 = smov 112  }
  0x20   : > { %v558_v2 = vld [vmem:[%s553_s20] sm:$0xff]  ;;  %v623_v10 = vand.u32 %v2682_v6, %v621_v9  ;;  %669 = vmatpush.bf16.msra.mxu1 %v2832_v14  ;;  %s3087_s0 = smov 104   ;;  %v3089_v41 = vmov 1983009808   ;;  %vm687_vm7 = vcmask 1047556   ;;  %vm1056_vm8 = vcmask 64512  }
  0x21   : > { %563 = vperm.xlu0 %2908, %v558_v2   ;;  %576 = vperm.xlu1 %2910, %v558_v2   ;;  %v2953_v31 = vld [vmem:[%s3897_s4] ss:$0 sm:$0xff]  ;;  %v692_v42 = vunpack.c.l.s4 %v3089_v41  ;;  %v3090_v51 = vmov 1934713408   ;;  %vm1184_vm9 = vcmask 1043456   ;;  %vm1381_vm10 = vcmask 130048  }
  0x22   : > { %629 = vmatpush.bf16.msra.mxu0 %v623_v10  ;;  %v716_v52 = vunpack.c.l.s4 %v3090_v51  ;;  %vm1383_vm11 = vcmask 195584   ;;  %vm1545_vm0 = vcmask 523264   ;;  %s2583_s20 = scalar_lea.sflag [#allocation3], %s548_s23 }
  0x23   : > { %v3285_v47 = vunpack.c.0.s8 %v692_v42 }
  0x24   : > { %670 = vmatpush.bf16.msra.mxu1 %v2831_v27  ;;  %v3294_v58 = vunpack.c.0.s8 %v716_v52 }
  0x26   : > { %630 = vmatpush.bf16.msra.mxu0 %v2829_v11 }
  0x29   : > { %2909 = vset.pattern.permute.xlu0 %v3082_v3 }
  0x2a   : > { %569 = vperm.xlu0 %2909, %v558_v2   ;;  %631 = vmatpush.bf16.msra.mxu0 %v2828_v12 }
  0x2e   : > { %632 = vmatpush.bf16.msra.mxu0 %v2827_v13 }
  0x32   : > { %2951 = vset.pattern.permute.xlu0 %v3081_v1 }
  0x93   : > { %v564_v16 = vpop.permute.xlu0 %563  ;;  %v577_v18 = vpop.permute.xlu1 %576 }
  0x94   : > { %vm565_vm2 = vcmp.eq.s32.totalorder %v561_v17, %v564_v16  ;;  %vm578_vm3 = vcmp.eq.s32.totalorder %v561_v17, %v577_v18 }
  0x95   : > { %v2664_v21 = vsel %vm565_vm2, 1.0, %v3084_v20  ;;  %v2666_v23 = vsel %vm578_vm3, 1.0, %v3084_v20 }
  0x9c   : > { %v570_v19 = vpop.permute.xlu0 %569 }
  0x9d   : > { %vm571_vm4 = vcmp.eq.s32.totalorder %v561_v17, %v570_v19 }
  0x9e   : > { %v2665_v22 = vsel %vm571_vm4, 1.0, %v3084_v20 }
  0x9f   : > { %v574_v24 = vadd.f32 %v2665_v22, %v2664_v21 }
  0xa1   : > { %v581_v25 = vadd.f32 %v2666_v23, %v574_v24 }
  0xa3   : > { %v582_v26 = vpack.c.bf16 %v581_v25, %v581_v25 }
  0xa5   : > { %2683 = vmatmul.msk.bf16.vlgmr.msra.gmra.mxu0 %vm614_vm5, %v582_v26 }
 0x122   : > { %v3265_v28 = vpop.f32.mrf.mxu0 }
 0x123   : > { %v638_v29 = vpack.c.bf16 %v3265_v28, %v3265_v28 }
 0x125   : > { %2692 = vmatmul.msk.bf16.vlgmr.msra.gmra.mxu1 %vm659_vm6, %v638_v29 }
 0x12a   : > { %v636_v30 = vpop.f32.mrf.mxu0 }
 0x1a2   : > { %v672_v32 = vpop.f32.mrf.mxu1 }
 0x1a3   : > { %v673_v33 = vadd.f32 %v2953_v31, %v672_v32 }
 0x1a5   : > { %680 = vrot.lane.b32.xlu2 %v673_v33, %s3085_s30  ;;  %677 = vrot.lane.b32.xlu1 %v673_v33, %s3086_s26  ;;  %v689_v44 = vrot.slane %v673_v33, 4 }
 0x1aa   : > { %v674_v34 = vpop.f32.mrf.mxu1 }
 0x1ad   : > { %683 = vrot.lane.b32.xlu2 %v673_v33, %s3087_s0 }
 0x1ff   : > { %v681_v35 = vpop.permute.xlu2 %680 }
 0x200   : > { %v686_v40 = vrot.slane %v681_v35, 4  ;;  %v690_v48 = vsel %vm687_vm7, %v681_v35, %v689_v44 }
 0x201   : > { %v698_v54 = vperm.slane %v690_v48, %v3285_v47 }
 0x202   : > { %v688_v43 = vsel %vm687_vm7, %v686_v40, %v673_v33 }
 0x203   : > { %v694_v50 = vperm.slane %v688_v43, %v3285_v47  ;;  %v725_v59 = vrot.slane %v698_v54, 4 }
 0x205   : > { %v713_v56 = vrot.slane %v694_v50, 4 }
 0x207   : > { %v684_v36 = vpop.permute.xlu2 %683 }
 0x208   : > { %v3276_v37 = vpack.i.bf16 %v684_v36, %v681_v35  ;;  %v699_v45 = vrot.slane %v684_v36, 4 }
 0x20a   : > { %2917 = vrot.lane.b32.xlu2 %v3276_v37, %s3924_s19 }
 0x217   : > { %v678_v38 = vpop.permute.xlu1 %677 }
 0x218   : > { %v3280_v39 = vpack.i.bf16 %v678_v38, %v673_v33  ;;  %v701_v46 = vrot.slane %v678_v38, 4  ;;  %v700_v49 = vsel %vm687_vm7, %v699_v45, %v678_v38 }
 0x219   : > { %v706_v55 = vperm.slane %v700_v49, %v3285_v47 }
 0x21a   : > { %2912 = vrot.lane.b32.xlu1 %v3280_v39, %s3924_s19  ;;  %v702_v53 = vsel %vm687_vm7, %v684_v36, %v701_v46  ;;  %s3036_s19 = scalar_lea.hbm %s3910_s17, 2 }
 0x21b   : > { %v710_v57 = vperm.slane %v702_v53, %v3285_v47  ;;  %v711_v60 = vrot.slane %v706_v55, 4  ;;  %v714_v61 = vsel %vm687_vm7, %v706_v55, %v713_v56 }
 0x21c   : > { %v722_v0 = vperm.slane %v714_v61, %v3294_v58 }
 0x21d   : > { %v723_v62 = vrot.slane %v710_v57, 4  ;;  %v726_v63 = vsel %vm687_vm7, %v710_v57, %v725_v59  ;;  %v712_v1 = vsel %vm687_vm7, %v711_v60, %v694_v50 }
 0x21e   : > { %v734_v2 = vperm.slane %v726_v63, %v3294_v58  ;;  %v718_v5 = vperm.slane %v712_v1, %v3294_v58  ;;  %v737_v6 = vrot.slane %v722_v0, 4 }
 0x21f   : > { %v724_v4 = vsel %vm687_vm7, %v723_v62, %v698_v54 }
 0x220   : > { %v730_v9 = vperm.slane %v724_v4, %v3294_v58  ;;  %v741_v10 = vrot.slane %v734_v2, 4  ;;  %v735_v11 = vrot.slane %v718_v5, 4  ;;  %v738_v12 = vsel %vm687_vm7, 0.0, %v737_v6 }
 0x221   : > { %v748_v24 = vrot.slane %v738_v12, 4  ;;  %v743_v63 = vsel %vm687_vm7, %v737_v6, %v718_v5 }
 0x222   : > { %v739_v18 = vrot.slane %v730_v9, 4  ;;  %v742_v19 = vsel %vm687_vm7, 0.0, %v741_v10  ;;  %v736_v27 = vsel %vm687_vm7, 0.0, %v735_v11  ;;  %v754_v49 = vsel %vm687_vm7, %v741_v10, %v730_v9 }
 0x223   : > { %v759_v29 = vrot.slane %v742_v19, 4  ;;  %v749_v45 = vsel %vm687_vm7, %v748_v24, %v736_v27  ;;  %v758_v60 = vperm.slane %v754_v49, %v3285_v47 }
 0x224   : > { %v740_v36 = vsel %vm687_vm7, 0.0, %v739_v18  ;;  %v753_v55 = vperm.slane %v749_v45, %v3285_v47 }
 0x225   : > { %v760_v50 = vsel %vm687_vm7, %v759_v29, %v740_v36  ;;  %v779_v12 = vrot.slane %v758_v60, 4 }
 0x226   : > { %v764_v0 = vperm.slane %v760_v50, %v3285_v47  ;;  %v765_v10 = vrot.slane %v753_v55, 4 }
 0x228   : > { %v777_v19 = vrot.slane %v764_v0, 4 }
 0x264   : > { %v2918_v3 = vpop.permute.xlu2 %2917 }
 0x265   : > { %v2920_v7 = vunpack.i.h.bf16 %v2918_v3  ;;  %v2919_v8 = vunpack.i.l.bf16 %v2918_v3 }
 0x267   : > { %v825_v14 = vrot.slane %v2920_v7, 4  ;;  %v813_v15 = vrot.slane %v2919_v8, 4 }
 0x28c   : > { %v2913_v13 = vpop.permute.xlu1 %2912 }
 0x28d   : > { %v2915_v16 = vunpack.i.h.bf16 %v2913_v13  ;;  %v2914_v17 = vunpack.i.l.bf16 %v2913_v13 }
 0x28f   : > { %v826_v20 = vsel %vm687_vm7, %v825_v14, %v2915_v16  ;;  %v827_v21 = vrot.slane %v2915_v16, 4  ;;  %v814_v22 = vsel %vm687_vm7, %v813_v15, %v2914_v17  ;;  %v815_v23 = vrot.slane %v2914_v17, 4 }
 0x290   : > { %v832_v25 = vperm.slane %v826_v20, %v3285_v47  ;;  %v820_v26 = vperm.slane %v814_v22, %v3285_v47  ;;  %v747_v15 = vperm.slane %v743_v63, %v3285_v47 }
 0x291   : > { %v828_v30 = vsel %vm687_vm7, %v2920_v7, %v827_v21  ;;  %v816_v31 = vsel %vm687_vm7, %v2919_v8, %v815_v23 }
 0x292   : > { %v836_v32 = vperm.slane %v828_v30, %v3285_v47  ;;  %v837_v33 = vrot.slane %v832_v25, 4  ;;  %v824_v34 = vperm.slane %v816_v31, %v3285_v47  ;;  %v839_v35 = vrot.slane %v820_v26, 4 }
 0x293   : > { %v766_v21 = vsel %vm687_vm7, %v765_v10, %v747_v15 }
 0x294   : > { %v849_v38 = vrot.slane %v836_v32, 4  ;;  %v838_v40 = vsel %vm687_vm7, %v837_v33, %v820_v26  ;;  %v840_v41 = vsel %vm687_vm7, %v832_v25, %v839_v35  ;;  %v851_v42 = vrot.slane %v824_v34, 4 }
 0x295   : > { %v844_v43 = vperm.slane %v838_v40, %v3294_v58  ;;  %v848_v44 = vperm.slane %v840_v41, %v3294_v58  ;;  %v780_v25 = vsel %vm687_vm7, %v764_v0, %v779_v12  ;;  %v772_v31 = vperm.slane %v766_v21, %v3294_v58 }
 0x296   : > { %v850_v46 = vsel %vm687_vm7, %v849_v38, %v824_v34  ;;  %v852_v48 = vsel %vm687_vm7, %v836_v32, %v851_v42  ;;  %v778_v32 = vsel %vm687_vm7, %v777_v19, %v758_v60  ;;  %v767_v33 = vrot.slane %v747_v15, 4 }
 0x297   : > { %v856_v51 = vperm.slane %v850_v46, %v3294_v58  ;;  %v860_v52 = vperm.slane %v852_v48, %v3294_v58  ;;  %v861_v53 = vrot.slane %v844_v43, 4  ;;  %v863_v54 = vrot.slane %v848_v44, 4 }
 0x298   : > { %v788_v38 = vperm.slane %v780_v25, %v3294_v58  ;;  %v784_v44 = vperm.slane %v778_v32, %v3294_v58  ;;  %v791_v48 = vrot.slane %v772_v31, 4  ;;  %v768_v49 = vsel %vm687_vm7, %v753_v55, %v767_v33 }
 0x299   : > { %v864_v56 = vsel %vm687_vm7, 0.0, %v863_v54  ;;  %v865_v57 = vrot.slane %v856_v51, 4  ;;  %v867_v59 = vrot.slane %v860_v52, 4  ;;  %v869_v62 = vsel %vm687_vm7, %v863_v54, %v844_v43 }
 0x29a   : > { %v874_v61 = vrot.slane %v864_v56, 4  ;;  %v862_v1 = vsel %vm687_vm7, 0.0, %v861_v53  ;;  %v873_v3 = vperm.slane %v869_v62, %v3285_v47  ;;  %v793_v52 = vrot.slane %v788_v38, 4 }
 0x29b   : > { %v868_v2 = vsel %vm687_vm7, 0.0, %v867_v59  ;;  %v880_v4 = vsel %vm687_vm7, %v867_v59, %v856_v51  ;;  %v866_v11 = vsel %vm687_vm7, 0.0, %v865_v57  ;;  %v776_v57 = vperm.slane %v768_v49, %v3294_v58 }
 0x29c   : > { %v885_v7 = vrot.slane %v868_v2, 4  ;;  %v875_v8 = vsel %vm687_vm7, %v874_v61, %v862_v1  ;;  %v884_v9 = vperm.slane %v880_v4, %v3285_v47  ;;  %v893_v6 = vrot.slane %v873_v3, 4 }
 0x29d   : > { %v879_v5 = vperm.slane %v875_v8, %v3285_v47  ;;  %v789_v59 = vrot.slane %v784_v44, 4  ;;  %v792_v61 = vsel %vm687_vm7, %v784_v44, %v791_v48  ;;  %v794_v62 = vsel %vm687_vm7, %v793_v52, %v776_v57  ;;  %v2952_v8 = vld [vmem:[%s3239_s18] ss:$0 sm:$0xff] }
 0x29e   : > { %v886_v13 = vsel %vm687_vm7, %v885_v7, %v866_v11  ;;  %v905_v14 = vrot.slane %v884_v9, 4  ;;  %v798_v0 = vpack.c.bf16 %v792_v61, %v792_v61  ;;  %v799_v1 = vpack.c.bf16 %v794_v62, %v794_v62 }
 0x29f   : > { %v890_v16 = vperm.slane %v886_v13, %v3285_v47  ;;  %v891_v17 = vrot.slane %v879_v5, 4  ;;  %v894_v18 = vsel %vm687_vm7, %v879_v5, %v893_v6  ;;  %v790_v63 = vsel %vm687_vm7, %v789_v59, %v772_v31 }
 0x2a0   : > { %v902_v20 = vperm.slane %v894_v18, %v3294_v58  ;;  %v797_v2 = vpack.c.bf16 %v790_v63, %v790_v63 }
 0x2a1   : > { %v892_v22 = vsel %vm687_vm7, %v891_v17, %v873_v3  ;;  %v903_v23 = vrot.slane %v890_v16, 4  ;;  %v906_v24 = vsel %vm687_vm7, %v890_v16, %v905_v14  ;;  %v795_v3 = vrot.slane %v776_v57, 4 }
 0x2a2   : > { %v898_v26 = vperm.slane %v892_v22, %v3294_v58  ;;  %v914_v27 = vperm.slane %v906_v24, %v3294_v58  ;;  %v921_v29 = vrot.slane %v902_v20, 4 }
 0x2a3   : > { %v904_v30 = vsel %vm687_vm7, %v903_v23, %v884_v9  ;;  %v796_v4 = vsel %vm687_vm7, %v788_v38, %v795_v3 }
 0x2a4   : > { %v910_v34 = vperm.slane %v904_v30, %v3294_v58  ;;  %v917_v35 = vrot.slane %v898_v26, 4  ;;  %v919_v36 = vrot.slane %v914_v27, 4  ;;  %v922_v40 = vsel %vm687_vm7, %v914_v27, %v921_v29 }
 0x2a5   : > { %v926_v51 = vpack.c.bf16 %v922_v40, %v922_v40  ;;  %v800_v7 = vpack.c.bf16 %v796_v4, %v796_v4 }
 0x2a6   : > { %v918_v41 = vsel %vm687_vm7, %v910_v34, %v917_v35  ;;  %v920_v42 = vsel %vm687_vm7, %v919_v36, %v902_v20  ;;  %v915_v43 = vrot.slane %v910_v34, 4 }
 0x2a7   : > { %v924_v45 = vpack.c.bf16 %v918_v41, %v918_v41  ;;  %v925_v46 = vpack.c.bf16 %v920_v42, %v920_v42  ;;  %v1118_v55 = vsel %vm1056_vm8, %v926_v51, 0 }
 0x2a8   : > { %v916_v50 = vsel %vm687_vm7, %v915_v43, %v898_v26 }
 0x2a9   : > { %v1080_v53 = vsel %vm1056_vm8, %v924_v45, 0  ;;  %v1099_v54 = vsel %vm1056_vm8, %v925_v46, 0  ;;  %v923_v56 = vpack.c.bf16 %v916_v50, %v916_v50 }
 0x2aa   : > { %1089 = vmatpush.bf16.xpose.msra.mxu3 %v1080_v53  ;;  %1108 = vmatpush.bf16.xpose.msrb.mxu1 %v1099_v54 }
 0x2ab   : > { %v1061_v60 = vsel %vm1056_vm8, %v923_v56, 0 }
 0x2ac   : > { %1070 = vmatpush.bf16.xpose.msra.mxu2 %v1061_v60 }
 0x2b1   : > { %2694 = vmatmul.msk.bf16.vlgmr.msra.gmra.mxu3 %vm1056_vm8, %v798_v0  ;;  %2695 = vmatmul.msk.bf16.vlgmr.msrb.gmra.mxu1 %vm1056_vm8, %v799_v1 }
 0x2b3   : > { %2693 = vmatmul.msk.bf16.vlgmr.msra.gmra.mxu2 %vm1056_vm8, %v797_v2 }
 0x2b4   : > { %1127 = vmatpush.bf16.xpose.msrb.mxu2 %v1118_v55 }
 0x2c3   : > { %2696 = vmatmul.msk.bf16.vlgmr.msrb.gmra.mxu2 %vm1056_vm8, %v800_v7 }
 0x32e   : > { %v1110_v9 = vpop.f32.mrf.mxu1 }
 0x32f   : > { %v1111_v10 = vadd.f32 %v2952_v8, %v1110_v9 }
 0x331   : > { %v1139_v11 = vsel %vm1056_vm8, %v1111_v10, -inf }
 0x332   : > { %1140 = vmax.xlane.f32.xlu2 %v1139_v11 }
 0x334   : > { %v1091_v5 = vpop.f32.mrf.mxu3 }
 0x335   : > { %v1092_v6 = vadd.f32 %v2952_v8, %v1091_v5 }
 0x336   : > { %v1072_v12 = vpop.f32.mrf.mxu2  ;;  %v1112_v13 = vpop.f32.mrf.mxu1 }
 0x337   : > { %v1073_v14 = vadd.f32 %v2952_v8, %v1072_v12  ;;  %v1136_v15 = vsel %vm1056_vm8, %v1092_v6, -inf }
 0x339   : > { %v1133_v16 = vsel %vm1056_vm8, %v1073_v14, -inf }
 0x33a   : > { %1137 = vmax.xlane.f32.xlu2 %v1136_v15  ;;  %1134 = vmax.xlane.f32.xlu0 %v1133_v16 }
 0x33c   : > { %v1093_v17 = vpop.f32.mrf.mxu3 }
 0x33e   : > { %v1074_v18 = vpop.f32.mrf.mxu2 }
 0x346   : > { %v1129_v19 = vpop.f32.mrf.mxu2 }
 0x347   : > { %v1130_v20 = vadd.f32 %v2952_v8, %v1129_v19 }
 0x349   : > { %v1142_v21 = vsel %vm1056_vm8, %v1130_v20, -inf }
 0x34a   : > { %1143 = vmax.xlane.f32.xlu1 %v1142_v21 }
 0x34e   : > { %v1131_v22 = vpop.f32.mrf.mxu2  ;;  %2922 = vrot.lane.b32.xlu0 %v3280_v39, %s3922_s24 }
 0x363   : > { %2927 = vrot.lane.b32.xlu1 %v3276_v37, %s3922_s24  ;;  %s3940_s24 = smov 96  }
 0x3a5   : > { %v1141_v23 = vpop.xlane.xlu2 %1140 }
 0x3a6   : > { %v1147_v24 = vsub.f32 %v1111_v10, %v1141_v23 }
 0x3a8   : > { %v1153_v25 = vmul.f32 1.442695, %v1147_v24 }
 0x3aa   : > { %2969 = vpow2.f32 %v1153_v25 }
 0x3ad   : > { %v1135_v26 = vpop.xlane.xlu0 %1134  ;;  %v1138_v37 = vpop.xlane.xlu2 %1137 }
 0x3ae   : > { %v1145_v27 = vsub.f32 %v1073_v14, %v1135_v26  ;;  %v1146_v35 = vsub.f32 %v1092_v6, %v1138_v37 }
 0x3b0   : > { %v3385_v29 = vpop.eup %2969  ;;  %v1149_v30 = vmul.f32 1.442695, %v1145_v27  ;;  %v1151_v38 = vmul.f32 1.442695, %v1146_v35 }
 0x3b1   : > { %v1163_v31 = vsel %vm1056_vm8, %v3385_v29, 0.0 }
 0x3b2   : > { %1164 = vadd.xlane.f32.xlu0 %v1163_v31  ;;  %2971 = vpow2.f32 %v1149_v30 }
 0x3b8   : > { %v3389_v32 = vpop.eup %2971 }
 0x3b9   : > { %v1157_v39 = vsel %vm1056_vm8, %v3389_v32, 0.0 }
 0x3ba   : > { %1158 = vadd.xlane.f32.xlu2 %v1157_v39 }
 0x3bd   : > { %v1144_v33 = vpop.xlane.xlu1 %1143 }
 0x3be   : > { %v1148_v34 = vsub.f32 %v1130_v20, %v1144_v33 }
 0x3c0   : > { %v1155_v36 = vmul.f32 1.442695, %v1148_v34  ;;  %v2923_v43 = vpop.permute.xlu0 %2922 }
 0x3c1   : > { %v2925_v45 = vunpack.i.h.bf16 %v2923_v43  ;;  %v2924_v46 = vunpack.i.l.bf16 %v2923_v43 }
 0x3c2   : > { %2973 = vpow2.f32 %v1155_v36 }
 0x3c3   : > { %2975 = vpow2.f32 %v1151_v38  ;;  %v953_v49 = vrot.slane %v2925_v45, 4  ;;  %v941_v50 = vrot.slane %v2924_v46, 4 }
 0x3c8   : > { %v3393_v40 = vpop.eup %2973 }
 0x3c9   : > { %v1166_v41 = vsel %vm1056_vm8, %v3393_v40, 0.0  ;;  %v3397_v42 = vpop.eup %2975 }
 0x3ca   : > { %1167 = vadd.xlane.f32.xlu2 %v1166_v41  ;;  %v1160_v44 = vsel %vm1056_vm8, %v3397_v42, 0.0 }
 0x3d2   : > { %1161 = vadd.xlane.f32.xlu2 %v1160_v44 }
 0x3d5   : > { %v2928_v48 = vpop.permute.xlu1 %2927 }
 0x3d6   : > { %v2930_v51 = vunpack.i.h.bf16 %v2928_v48  ;;  %v2929_v52 = vunpack.i.l.bf16 %v2928_v48 }
 0x3d8   : > { %v951_v53 = vrot.slane %v2930_v51, 4  ;;  %v939_v54 = vrot.slane %v2929_v52, 4  ;;  %v942_v56 = vsel %vm687_vm7, %v2929_v52, %v941_v50  ;;  %v954_v57 = vsel %vm687_vm7, %v2930_v51, %v953_v49 }
 0x3d9   : > { %v950_v59 = vperm.slane %v942_v56, %v3285_v47  ;;  %v962_v60 = vperm.slane %v954_v57, %v3285_v47 }
 0x3da   : > { %v940_v55 = vsel %vm687_vm7, %v939_v54, %v2924_v46  ;;  %v952_v61 = vsel %vm687_vm7, %v951_v53, %v2925_v45 }
 0x3db   : > { %v946_v62 = vperm.slane %v940_v55, %v3285_v47  ;;  %v958_v63 = vperm.slane %v952_v61, %v3285_v47  ;;  %v975_v0 = vrot.slane %v962_v60, 4  ;;  %v977_v1 = vrot.slane %v950_v59, 4 }
 0x3dd   : > { %v963_v2 = vrot.slane %v958_v63, 4  ;;  %v965_v3 = vrot.slane %v946_v62, 4  ;;  %v976_v4 = vsel %vm687_vm7, %v975_v0, %v950_v59  ;;  %v978_v7 = vsel %vm687_vm7, %v962_v60, %v977_v1 }
 0x3de   : > { %v982_v8 = vperm.slane %v976_v4, %v3294_v58  ;;  %v986_v9 = vperm.slane %v978_v7, %v3294_v58 }
 0x3df   : > { %v964_v10 = vsel %vm687_vm7, %v963_v2, %v946_v62  ;;  %v966_v11 = vsel %vm687_vm7, %v958_v63, %v965_v3 }
 0x3e0   : > { %v970_v5 = vperm.slane %v964_v10, %v3294_v58  ;;  %v974_v6 = vperm.slane %v966_v11, %v3294_v58  ;;  %v991_v12 = vrot.slane %v982_v8, 4  ;;  %v993_v13 = vrot.slane %v986_v9, 4 }
 0x3e2   : > { %v987_v14 = vrot.slane %v970_v5, 4  ;;  %v989_v15 = vrot.slane %v974_v6, 4  ;;  %v994_v16 = vsel %vm687_vm7, 0.0, %v993_v13  ;;  %v1006_v17 = vsel %vm687_vm7, %v993_v13, %v982_v8 }
 0x3e3   : > { %v1011_v18 = vrot.slane %v994_v16, 4  ;;  %v992_v20 = vsel %vm687_vm7, 0.0, %v991_v12  ;;  %v1010_v21 = vperm.slane %v1006_v17, %v3285_v47 }
 0x3e4   : > { %v990_v19 = vsel %vm687_vm7, 0.0, %v989_v15  ;;  %v995_v22 = vsel %vm687_vm7, %v989_v15, %v970_v5  ;;  %v988_v26 = vsel %vm687_vm7, 0.0, %v987_v14 }
 0x3e5   : > { %v1000_v23 = vrot.slane %v990_v19, 4  ;;  %v999_v24 = vperm.slane %v995_v22, %v3285_v47  ;;  %v1012_v25 = vsel %vm687_vm7, %v1011_v18, %v992_v20  ;;  %v1031_v30 = vrot.slane %v1010_v21, 4 }
 0x3e6   : > { %v1016_v27 = vperm.slane %v1012_v25, %v3285_v47 }
 0x3e7   : > { %v1001_v31 = vsel %vm687_vm7, %v1000_v23, %v988_v26  ;;  %v1019_v39 = vrot.slane %v999_v24, 4 }
 0x3e8   : > { %v1005_v37 = vperm.slane %v1001_v31, %v3285_v47  ;;  %v1032_v33 = vsel %vm687_vm7, %v1016_v27, %v1031_v30  ;;  %v1029_v34 = vrot.slane %v1016_v27, 4 }
 0x3e9   : > { %v1040_v35 = vperm.slane %v1032_v33, %v3294_v58 }
 0x3ea   : > { %v1020_v36 = vsel %vm687_vm7, %v1005_v37, %v1019_v39  ;;  %v1017_v38 = vrot.slane %v1005_v37, 4  ;;  %v1030_v41 = vsel %vm687_vm7, %v1029_v34, %v1010_v21 }
 0x3eb   : > { %v1028_v43 = vperm.slane %v1020_v36, %v3294_v58  ;;  %v1045_v44 = vrot.slane %v1040_v35, 4  ;;  %v1036_v45 = vperm.slane %v1030_v41, %v3294_v58 }
 0x3ec   : > { %v1018_v46 = vsel %vm687_vm7, %v1017_v38, %v999_v24 }
 0x3ed   : > { %v1046_v48 = vsel %vm687_vm7, %v1045_v44, %v1028_v43  ;;  %v1024_v49 = vperm.slane %v1018_v46, %v3294_v58  ;;  %v1041_v50 = vrot.slane %v1036_v45, 4  ;;  %v1047_v51 = vrot.slane %v1028_v43, 4 }
 0x3ee   : > { %v1051_v52 = vpack.c.bf16 %v1046_v48, %v1046_v48 }
 0x3ef   : > { %v1042_v53 = vsel %vm687_vm7, %v1041_v50, %v1024_v49  ;;  %v1048_v54 = vsel %vm687_vm7, %v1040_v35, %v1047_v51  ;;  %v1043_v56 = vrot.slane %v1024_v49, 4 }
 0x3f0   : > { %v1224_v57 = vsel %vm1184_vm9, %v1051_v52, 0  ;;  %v1049_v59 = vpack.c.bf16 %v1042_v53, %v1042_v53  ;;  %v1052_v60 = vpack.c.bf16 %v1048_v54, %v1048_v54 }
 0x3f1   : > { %1233 = vmatpush.bf16.msra.mxu1 %v1224_v57  ;;  %v1044_v55 = vsel %vm687_vm7, %v1036_v45, %v1043_v56 }
 0x3f2   : > { %v1186_v61 = vsel %vm1184_vm9, %v1049_v59, 0  ;;  %v1243_v62 = vsel %vm1184_vm9, %v1052_v60, 0  ;;  %v1050_v63 = vpack.c.bf16 %v1044_v55, %v1044_v55 }
 0x3f3   : > { %1195 = vmatpush.bf16.msrb.mxu3 %v1186_v61  ;;  %1252 = vmatpush.bf16.msra.mxu2 %v1243_v62 }
 0x3f4   : > { %v1205_v0 = vsel %vm1184_vm9, %v1050_v63, 0 }
 0x3f5   : > { %1214 = vmatpush.bf16.msrb.mxu0 %v1205_v0 }
 0x425   : > { %v1165_v1 = vpop.xlane.xlu0 %1164 }
 0x426   : > { %2977 = vrcp.f32 %v1165_v1 }
 0x42c   : > { %v2978_v2 = vpop.eup %2977 }
 0x42d   : > { %v1175_v3 = vmul.f32 %v2978_v2, %v3385_v29  ;;  %v1159_v4 = vpop.xlane.xlu2 %1158 }
 0x42e   : > { %2979 = vrcp.f32 %v1159_v4 }
 0x42f   : > { %v1179_v7 = vpack.c.bf16 %v1175_v3, %v1175_v3 }
 0x431   : > { %2699 = vmatmul.msk.bf16.vlgmr.msra.gmra.mxu1 %vm1056_vm8, %v1179_v7 }
 0x434   : > { %v2980_v8 = vpop.eup %2979 }
 0x435   : > { %v1173_v9 = vmul.f32 %v2980_v8, %v3389_v32 }
 0x437   : > { %v1177_v10 = vpack.c.bf16 %v1173_v9, %v1173_v9 }
 0x439   : > { %2697 = vmatmul.msk.bf16.vlgmr.msrb.gmra.mxu3 %vm1056_vm8, %v1177_v10 }
 0x43d   : > { %v1168_v11 = vpop.xlane.xlu2 %1167 }
 0x43e   : > { %2981 = vrcp.f32 %v1168_v11 }
 0x444   : > { %v2982_v5 = vpop.eup %2981 }
 0x445   : > { %v1176_v6 = vmul.f32 %v2982_v5, %v3393_v40  ;;  %v1162_v12 = vpop.xlane.xlu2 %1161 }
 0x446   : > { %2983 = vrcp.f32 %v1162_v12 }
 0x447   : > { %v1180_v13 = vpack.c.bf16 %v1176_v6, %v1176_v6 }
 0x449   : > { %2700 = vmatmul.msk.bf16.vlgmr.msra.gmra.mxu2 %vm1056_vm8, %v1180_v13 }
 0x44c   : > { %v2984_v29 = vpop.eup %2983 }
 0x44d   : > { %v1174_v14 = vmul.f32 %v2984_v29, %v3397_v42 }
 0x44f   : > { %v1178_v15 = vpack.c.bf16 %v1174_v14, %v1174_v14 }
 0x451   : > { %2698 = vmatmul.msk.bf16.vlgmr.msrb.gmra.mxu0 %vm1056_vm8, %v1178_v15 }
 0x4ae   : > { %v1235_v32 = vpop.f32.mrf.mxu1 }
 0x4af   : > { %v1258_v19 = vrot.slane %v1235_v32, 4 }
 0x4b6   : > { %v1237_v16 = vpop.f32.mrf.mxu1 }
 0x4bc   : > { %v1197_v17 = vpop.f32.mrf.mxu3 }
 0x4bd   : > { %v1260_v20 = vrot.slane %v1197_v17, 4  ;;  %v1259_v21 = vsel %vm687_vm7, %v1258_v19, %v1197_v17 }
 0x4be   : > { %v1265_v22 = vperm.slane %v1259_v21, %v3285_v47 }
 0x4bf   : > { %v1261_v40 = vsel %vm687_vm7, %v1235_v32, %v1260_v20 }
 0x4c0   : > { %v1269_v25 = vperm.slane %v1261_v40, %v3285_v47  ;;  %v1284_v30 = vrot.slane %v1265_v22, 4 }
 0x4c2   : > { %v1296_v37 = vrot.slane %v1269_v25, 4 }
 0x4c4   : > { %v1199_v18 = vpop.f32.mrf.mxu3 }
 0x4cc   : > { %v1254_v23 = vpop.f32.mrf.mxu2 }
 0x4cd   : > { %v1270_v24 = vrot.slane %v1254_v23, 4 }
 0x4ce   : > { %v1216_v42 = vpop.f32.mrf.mxu0 }
 0x4cf   : > { %v1271_v26 = vsel %vm687_vm7, %v1270_v24, %v1216_v42  ;;  %v1272_v27 = vrot.slane %v1216_v42, 4  ;;  %v2833_v24 = vld [vmem:[%s3898_s5] sm:$0xff] }
 0x4d0   : > { %v1277_v31 = vperm.slane %v1271_v26, %v3285_v47 }
 0x4d1   : > { %v1273_v39 = vsel %vm687_vm7, %v1254_v23, %v1272_v27  ;;  %v2834_v23 = vld [vmem:[%s3898_s5 + $0x8] sm:$0xff] }
 0x4d2   : > { %v1281_v33 = vperm.slane %v1273_v39, %v3285_v47  ;;  %v1282_v34 = vrot.slane %v1277_v31, 4  ;;  %v1285_v35 = vsel %vm687_vm7, %v1277_v31, %v1284_v30  ;;  %1415 = vmatpush.bf16.msra.mxu3 %v2834_v23 }
 0x4d3   : > { %v1293_v36 = vperm.slane %v1285_v35, %v3294_v58 }
 0x4d4   : > { %v1283_v38 = vsel %vm687_vm7, %v1282_v34, %v1265_v22  ;;  %v1294_v41 = vrot.slane %v1281_v33, 4  ;;  %v1297_v43 = vsel %vm687_vm7, %v1281_v33, %v1296_v37  ;;  %v1256_v44 = vpop.f32.mrf.mxu2  ;;  %v2954_v37 = vld [vmem:[%s3899_s6] ss:$0 sm:$0xff] }
 0x4d5   : > { %v1289_v45 = vperm.slane %v1283_v38, %v3294_v58  ;;  %v1305_v46 = vperm.slane %v1297_v43, %v3294_v58  ;;  %v1308_v48 = vrot.slane %v1293_v36, 4 }
 0x4d6   : > { %v1295_v49 = vsel %vm687_vm7, %v1294_v41, %v1269_v25  ;;  %v1218_v50 = vpop.f32.mrf.mxu0  ;;  %1416 = vmatpush.bf16.msra.mxu3 %v2833_v24  ;;  %v3095_v41 = vmov 32.0   ;;  %v2958_v24 = vld [vmem:[%s3905_s12] ss:$0 sm:$0xff] }
 0x4d7   : > { %v1301_v51 = vperm.slane %v1295_v49, %v3294_v58  ;;  %v1306_v52 = vrot.slane %v1289_v45, 4  ;;  %v1309_v53 = vsel %vm687_vm7, 0.0, %v1308_v48  ;;  %v1312_v54 = vrot.slane %v1305_v46, 4 }
 0x4d8   : > { %v1314_v56 = vsel %vm687_vm7, %v1308_v48, %v1289_v45  ;;  %v1319_v57 = vrot.slane %v1309_v53, 4  ;;  %2985 = vrcp.f32 %v3095_v41 }
 0x4d9   : > { %v1307_v59 = vsel %vm687_vm7, 0.0, %v1306_v52  ;;  %v1310_v60 = vrot.slane %v1301_v51, 4  ;;  %v1313_v55 = vsel %vm687_vm7, 0.0, %v1312_v54  ;;  %v1318_v61 = vperm.slane %v1314_v56, %v3285_v47  ;;  %v2835_v56 = vld [vmem:[%s3902_s9] sm:$0xff] }
 0x4da   : > { %v1330_v62 = vrot.slane %v1313_v55, 4  ;;  %v1320_v63 = vsel %vm687_vm7, %v1319_v57, %v1307_v59  ;;  %v1325_v0 = vsel %vm687_vm7, %v1312_v54, %v1301_v51  ;;  %v2836_v54 = vld [vmem:[%s3902_s9 + $0x8] sm:$0xff] }
 0x4db   : > { %v1311_v1 = vsel %vm687_vm7, 0.0, %v1310_v60  ;;  %v1324_v2 = vperm.slane %v1320_v63, %v3285_v47  ;;  %v1329_v3 = vperm.slane %v1325_v0, %v3285_v47  ;;  %v1338_v4 = vrot.slane %v1318_v61, 4  ;;  %1492 = vmatpush.bf16.msra.mxu0 %v2836_v54 }
 0x4dc   : > { %v1331_v7 = vsel %vm687_vm7, %v1330_v62, %v1311_v1 }
 0x4dd   : > { %v1335_v8 = vperm.slane %v1331_v7, %v3285_v47  ;;  %v1350_v9 = vrot.slane %v1329_v3, 4  ;;  %v1336_v10 = vrot.slane %v1324_v2, 4  ;;  %v1339_v11 = vsel %vm687_vm7, %v1324_v2, %v1338_v4  ;;  %v2955_v2 = vld [vmem:[%s3900_s7] ss:$0 sm:$0xff] }
 0x4de   : > { %v1347_v15 = vperm.slane %v1339_v11, %v3294_v58  ;;  %v2986_v43 = vpop.eup %2985  ;;  %v2956_v4 = vld [vmem:[%s3901_s8] ss:$0 sm:$0xff]  ;;  %v2840_v11 = vld [vmem:[%s3904_s11 + $0x18] sm:$0xff] }
 0x4df   : > { %v1351_v5 = vsel %vm687_vm7, %v1335_v8, %v1350_v9  ;;  %v1337_v6 = vsel %vm687_vm7, %v1336_v10, %v1318_v61  ;;  %v1348_v12 = vrot.slane %v1335_v8, 4  ;;  %v1429_v44 = vmul.f32 32.0, %v2986_v43  ;;  %1493 = vmatpush.bf16.msra.mxu0 %v2835_v56  ;;  %1553 = vmatpush.bf16.msrb.mxu1 %v2840_v11 }
 0x4e0   : > { %v1359_v13 = vperm.slane %v1351_v5, %v3294_v58  ;;  %v1343_v29 = vperm.slane %v1337_v6, %v3294_v58  ;;  %v1366_v40 = vrot.slane %v1347_v15, 4  ;;  %vm1433_vm12 = vweird.f32 %v2986_v43  ;;  %v2839_v5 = vld [vmem:[%s3904_s11 + $0x10] sm:$0xff]  ;;  %v2838_v6 = vld [vmem:[%s3904_s11 + $0x8] sm:$0xff] }
 0x4e1   : > { %v1349_v14 = vsel %vm687_vm7, %v1348_v12, %v1329_v3  ;;  %v1430_v45 = vsub.f32 1.0, %v1429_v44  ;;  %v2837_v12 = vld [vmem:[%s3904_s11] sm:$0xff] }
 0x4e2   : > { %v1364_v32 = vrot.slane %v1359_v13, 4  ;;  %v1355_v16 = vperm.slane %v1349_v14, %v3294_v58  ;;  %v1362_v17 = vrot.slane %v1343_v29, 4  ;;  %v1367_v22 = vsel %vm687_vm7, %v1359_v13, %v1366_v40  ;;  %v2957_v13 = vld [vmem:[%s3903_s10] ss:$0 sm:$0xff] }
 0x4e3   : > { %v1431_v46 = vmul.f32 %v2986_v43, %v1430_v45  ;;  %1554 = vmatpush.bf16.msrb.mxu1 %v2839_v5 }
 0x4e4   : > { %v1365_v18 = vsel %vm687_vm7, %v1364_v32, %v1347_v15  ;;  %v1360_v19 = vrot.slane %v1355_v16, 4  ;;  %v1363_v20 = vsel %vm687_vm7, %v1355_v16, %v1362_v17 }
 0x4e5   : > { %1373 = vrot.lane.b32.xlu2 %v1365_v18, %s3921_s16  ;;  %1369 = vrot.lane.b32.xlu1 %v1363_v20, %s3920_s27  ;;  %v1432_v48 = vadd.f32 %v2986_v43, %v1431_v46  ;;  %s549_s27 = scalar_lea.vmem [#allocation2], %s548_s23 }
 0x4e6   : > { %v1361_v21 = vsel %vm687_vm7, %v1360_v19, %v1343_v29 }
 0x4e7   : > { %v3511_v49 = vsel %vm1433_vm12, %v2986_v43, %v1432_v48  ;;  %1555 = vmatpush.bf16.msrb.mxu1 %v2838_v6 }
 0x4eb   : > { %1556 = vmatpush.bf16.msrb.mxu1 %v2837_v12 }
 0x4ed   : > { %1377 = vrot.lane.b32.xlu1 %v1367_v22, %s3919_s1  ;;  %s2593_s1 = sshll.u32 %s549_s27, 4  ;;  %s2594_s1 = int_to_ptr.vmem [resolvable:$true] %s2593_s1 }
 0x53f   : > { %v1374_v26 = vpop.permute.xlu2 %1373 }
 0x557   : > { %v1370_v25 = vpop.permute.xlu1 %1369 }
 0x558   : > { %v1380_v42 = vsel %vm1056_vm8, %v1361_v21, %v1370_v25 }
 0x559   : > { %v1382_v30 = vsel %vm1381_vm10, %v1380_v42, %v1374_v26 }
 0x55f   : > { %v1378_v27 = vpop.permute.xlu1 %1377 }
 0x560   : > { %v1384_v31 = vsel %vm1383_vm11, %v1382_v30, %v1378_v27 }
 0x561   : > { %v1385_v39 = vpack.c.bf16 %v1384_v31, %v1384_v31 }
 0x563   : > { %2709 = vmatmul.msk.bf16.vlgmr.msra.gmra.mxu3 %vm659_vm6, %v1385_v39 }
 0x5e6   : > { %v1418_v33 = vpop.f32.mrf.mxu3 }
 0x5e7   : > { %v1419_v34 = vadd.f32 %v2954_v37, %v1418_v33 }
 0x5e9   : > { %v1422_v35 = vadd.f32 %v1419_v34, %v3265_v28 }
 0x5eb   : > { %v1425_v36 = vsel %vm659_vm6, %v1422_v35, 0.0 }
 0x5ec   : > { %1426 = vadd.xlane.f32.xlu1 %v1425_v36  ;;  %v2841_v36 = vld [vmem:[%s3896_s3 + $0x10] sm:$0xff] }
 0x5ee   : > { %v1420_v38 = vpop.f32.mrf.mxu3 }
 0x65f   : > { %v1427_v50 = vpop.xlane.xlu1 %1426 }
 0x660   : > { %v1435_v51 = vmul.f32 %v3511_v49, %v1427_v50 }
 0x662   : > { %v1436_v52 = vsub.f32 %v1422_v35, %v1435_v51  ;;  %v2842_v35 = vld [vmem:[%s3896_s3 + $0x18] sm:$0xff] }
 0x663   : > { %1627 = vmatpush.bf16.msrb.mxu2 %v2842_v35 }
 0x664   : > { %v1437_v53 = vmul.f32 %v1436_v52, %v1436_v52 }
 0x666   : > { %v1438_v28 = vsel %vm659_vm6, %v1437_v53, 0.0 }
 0x667   : > { %1439 = vadd.xlane.f32.xlu2 %v1438_v28  ;;  %1628 = vmatpush.bf16.msrb.mxu2 %v2841_v36  ;;  %v2960_v28 = vld [vmem:[%s3907_s14] ss:$0 sm:$0xff] }
 0x6da   : > { %v1440_v57 = vpop.xlane.xlu2 %1439 }
 0x6db   : > { %v1441_v59 = vmul.f32 %v1440_v57, %v3511_v49 }
 0x6dd   : > { %v1442_v60 = vadd.f32 1e-12, %v1441_v59 }
 0x6df   : > { %2987 = vrsqrt.f32 %v1442_v60  ;;  %vm1449_vm14 = vweird.f32 %v1442_v60 }
 0x6e5   : > { %v2988_v55 = vpop.eup %2987 }
 0x6e6   : > { %v1444_v61 = vmul.f32 %v2988_v55, %v1442_v60  ;;  %vm1450_vm13 = vweird.f32 %v2988_v55  ;;  %v2961_v60 = vld [vmem:[%s3897_s4 + $0x1] ss:$0 sm:$0xff] }
 0x6e7   : > { %vm1451_vm15 = vmor %vm1449_vm14, %vm1450_vm13 }
 0x6e8   : > { %v1445_v62 = vmul.f32 %v2988_v55, %v1444_v61 }
 0x6ea   : > { %v1446_v63 = vmul.f32 0.5, %v1445_v62 }
 0x6ec   : > { %v1447_v0 = vsub.f32 1.5, %v1446_v63 }
 0x6ee   : > { %v1448_v1 = vmul.f32 %v2988_v55, %v1447_v0 }
 0x6f0   : > { %v1452_v3 = vsel %vm1451_vm15, %v2988_v55, %v1448_v1 }
 0x6f1   : > { %v1453_v7 = vmul.f32 %v1452_v3, %v1436_v52  ;;  %v2959_v52 = vld [vmem:[%s3906_s13] ss:$0 sm:$0xff] }
 0x6f3   : > { %v1457_v8 = vmul.f32 %v2955_v2, %v1453_v7 }
 0x6f5   : > { %v1461_v9 = vadd.f32 %v2956_v4, %v1457_v8 }
 0x6f7   : > { %v1462_v10 = vpack.c.bf16 %v1461_v9, %v1461_v9 }
 0x6f9   : > { %2718 = vmatmul.msk.bf16.vlgmr.msra.gmra.mxu0 %vm659_vm6, %v1462_v10 }
 0x776   : > { %v1495_v29 = vpop.f32.mrf.mxu0 }
 0x777   : > { %v1496_v14 = vadd.f32 %v2957_v13, %v1495_v29 }
 0x779   : > { %v1500_v15 = vmul.f32 0.044715, %v1496_v14  ;;  %v1499_v21 = vmul.f32 0.5, %v1496_v14 }
 0x77b   : > { %v1501_v32 = vmul.f32 %v1500_v15, %v1496_v14 }
 0x77d   : > { %v1502_v16 = vmul.f32 %v1501_v32, %v1496_v14 }
 0x77e   : > { %v1497_v17 = vpop.f32.mrf.mxu0 }
 0x77f   : > { %v1503_v18 = vadd.f32 %v1502_v16, %v1496_v14 }
 0x781   : > { %v1504_v19 = vmul.f32 0.7978846, %v1503_v18 }
 0x783   : > { %2989 = vtanh.f32 %v1504_v19 }
 0x789   : > { %v2990_v20 = vpop.eup %2989 }
 0x78a   : > { %v1506_v40 = vadd.f32 1.0, %v2990_v20 }
 0x78c   : > { %v1507_v22 = vmul.f32 %v1506_v40, %v1499_v21 }
 0x78e   : > { %v1508_v23 = vpack.c.bf16 %v1507_v22, %v1507_v22 }
 0x790   : > { %2735 = vmatmul.msk.bf16.vlgmr.msrb.gmra.mxu1 %vm1545_vm0, %v1508_v23 }
 0x80d   : > { %v1558_v25 = vpop.f32.mrf.mxu1 }
 0x80e   : > { %v1559_v42 = vadd.f32 %v2958_v24, %v1558_v25 }
 0x810   : > { %v1562_v26 = vadd.f32 %v1559_v42, %v1461_v9 }
 0x812   : > { %v1565_v27 = vsel %vm659_vm6, %v1562_v26, 0.0 }
 0x813   : > { %1566 = vadd.xlane.f32.xlu0 %v1565_v27 }
 0x815   : > { %v1560_v30 = vpop.f32.mrf.mxu1 }
 0x886   : > { %v1567_v31 = vpop.xlane.xlu0 %1566 }
 0x887   : > { %v1568_v39 = vmul.f32 %v1567_v31, %v3511_v49 }
 0x889   : > { %v1569_v37 = vsub.f32 %v1562_v26, %v1568_v39 }
 0x88b   : > { %v1570_v33 = vmul.f32 %v1569_v37, %v1569_v37 }
 0x88d   : > { %v1571_v34 = vsel %vm659_vm6, %v1570_v33, 0.0 }
 0x88e   : > { %1572 = vadd.xlane.f32.xlu0 %v1571_v34 }
 0x901   : > { %v1573_v38 = vpop.xlane.xlu0 %1572 }
 0x902   : > { %v1574_v41 = vmul.f32 %v1573_v38, %v3511_v49 }
 0x904   : > { %v1575_v43 = vadd.f32 1e-12, %v1574_v41 }
 0x906   : > { %2991 = vrsqrt.f32 %v1575_v43  ;;  %vm1582_vm2 = vweird.f32 %v1575_v43 }
 0x90c   : > { %v2992_v44 = vpop.eup %2991 }
 0x90d   : > { %v1577_v45 = vmul.f32 %v2992_v44, %v1575_v43  ;;  %vm1583_vm1 = vweird.f32 %v2992_v44 }
 0x90e   : > { %vm1584_vm3 = vmor %vm1582_vm2, %vm1583_vm1 }
 0x90f   : > { %v1578_v46 = vmul.f32 %v2992_v44, %v1577_v45 }
 0x911   : > { %v1579_v48 = vmul.f32 0.5, %v1578_v46 }
 0x913   : > { %v1580_v50 = vsub.f32 1.5, %v1579_v48 }
 0x915   : > { %v1581_v51 = vmul.f32 %v2992_v44, %v1580_v50 }
 0x917   : > { %v1585_v53 = vsel %vm1584_vm3, %v2992_v44, %v1581_v51 }
 0x918   : > { %v1586_v54 = vmul.f32 %v1585_v53, %v1569_v37 }
 0x91a   : > { %v1590_v56 = vmul.f32 %v2959_v52, %v1586_v54 }
 0x91c   : > { %v3564_v57 = vadd.f32 %v2960_v28, %v1590_v56 }
 0x91e   : > { %v1595_v59 = vpack.c.bf16 %v3564_v57, %v3564_v57 }
 0x920   : > { %2749 = vmatmul.msk.bf16.vlgmr.msrb.gmra.mxu2 %vm659_vm6, %v1595_v59 }
 0x9a3   : > { %v1630_v55 = vpop.f32.mrf.mxu2 }
 0x9a4   : > { %v1631_v61 = vadd.f32 %v2961_v60, %v1630_v55 }
 0x9a6   : > { %1641 = vrot.lane.b32.xlu2 %v1631_v61, %s3087_s0  ;;  %1638 = vrot.lane.b32.xlu1 %v1631_v61, %s3085_s30  ;;  %v1646_v7 = vrot.slane %v1631_v61, 4  ;;  %s3942_s30 = smov 16   ;;  %s3944_s0 = smov 24  }
 0x9a7   : > { %1635 = vrot.lane.b32.xlu0 %v1631_v61, %s3086_s26  ;;  %s3943_s26 = smov 8  }
 0x9ab   : > { %v1632_v62 = vpop.f32.mrf.mxu2 }
 0xa00   : > { %v1642_v2 = vpop.permute.xlu2 %1641 }
 0xa01   : > { %v1656_v5 = vrot.slane %v1642_v2, 4 }
 0xa18   : > { %v1639_v1 = vpop.permute.xlu1 %1638 }
 0xa19   : > { %v1636_v63 = vpop.permute.xlu0 %1635  ;;  %v3579_v3 = vpack.i.bf16 %v1642_v2, %v1639_v1  ;;  %v1644_v4 = vrot.slane %v1639_v1, 4  ;;  %v1647_v8 = vsel %vm687_vm7, %v1639_v1, %v1646_v7 }
 0xa1a   : > { %v3575_v0 = vpack.i.bf16 %v1636_v63, %v1631_v61  ;;  %v1658_v9 = vrot.slane %v1636_v63, 4  ;;  %v1655_v11 = vperm.slane %v1647_v8, %v3285_v47  ;;  %v1657_v13 = vsel %vm687_vm7, %v1656_v5, %v1636_v63 }
 0xa1b   : > { %v1645_v10 = vsel %vm687_vm7, %v1644_v4, %v1631_v61  ;;  %v1663_v32 = vperm.slane %v1657_v13, %v3285_v47 }
 0xa1c   : > { %2932 = vrot.lane.b32.xlu0 %v3575_v0, %s3940_s24  ;;  %v1659_v6 = vsel %vm687_vm7, %v1642_v2, %v1658_v9  ;;  %v1651_v12 = vperm.slane %v1645_v10, %v3285_v47  ;;  %v1682_v29 = vrot.slane %v1655_v11, 4 }
 0xa1d   : > { %v1667_v14 = vperm.slane %v1659_v6, %v3285_v47  ;;  %v1668_v18 = vrot.slane %v1663_v32, 4 }
 0xa1e   : > { %v1670_v15 = vrot.slane %v1651_v12, 4 }
 0xa1f   : > { %v1680_v16 = vrot.slane %v1667_v14, 4  ;;  %v1683_v17 = vsel %vm687_vm7, %v1667_v14, %v1682_v29  ;;  %v1669_v23 = vsel %vm687_vm7, %v1668_v18, %v1651_v12 }
 0xa20   : > { %v1671_v19 = vsel %vm687_vm7, %v1663_v32, %v1670_v15  ;;  %v1691_v20 = vperm.slane %v1683_v17, %v3294_v58  ;;  %v1675_v27 = vperm.slane %v1669_v23, %v3294_v58 }
 0xa21   : > { %v1681_v40 = vsel %vm687_vm7, %v1680_v16, %v1655_v11  ;;  %v1679_v22 = vperm.slane %v1671_v19, %v3294_v58 }
 0xa22   : > { %v1687_v24 = vperm.slane %v1681_v40, %v3294_v58  ;;  %v1698_v25 = vrot.slane %v1691_v20, 4  ;;  %v1692_v38 = vrot.slane %v1675_v27, 4 }
 0xa23   : > { %v1694_v30 = vrot.slane %v1679_v22, 4 }
 0xa24   : > { %2937 = vrot.lane.b32.xlu0 %v3579_v3, %s3940_s24  ;;  %v1696_v31 = vrot.slane %v1687_v24, 4  ;;  %v1699_v39 = vsel %vm687_vm7, 0.0, %v1698_v25  ;;  %v1711_v48 = vsel %vm687_vm7, %v1698_v25, %v1687_v24  ;;  %v1693_v62 = vsel %vm687_vm7, 0.0, %v1692_v38 }
 0xa25   : > { %v1695_v41 = vsel %vm687_vm7, 0.0, %v1694_v30  ;;  %v1716_v50 = vrot.slane %v1699_v39, 4  ;;  %v1700_v63 = vsel %vm687_vm7, %v1694_v30, %v1675_v27  ;;  %v1715_v8 = vperm.slane %v1711_v48, %v3285_v47 }
 0xa26   : > { %v1697_v53 = vsel %vm687_vm7, 0.0, %v1696_v31  ;;  %v1705_v28 = vrot.slane %v1695_v41, 4  ;;  %v1704_v5 = vperm.slane %v1700_v63, %v3285_v47 }
 0xa27   : > { %v1717_v9 = vsel %vm687_vm7, %v1716_v50, %v1697_v53  ;;  %v1736_v20 = vrot.slane %v1715_v8, 4 }
 0xa28   : > { %v1706_v6 = vsel %vm687_vm7, %v1705_v28, %v1693_v62  ;;  %v1721_v16 = vperm.slane %v1717_v9, %v3285_v47  ;;  %v1724_v40 = vrot.slane %v1704_v5, 4 }
 0xa2a   : > { %v1734_v39 = vrot.slane %v1721_v16, 4  ;;  %v1737_v38 = vsel %vm687_vm7, %v1721_v16, %v1736_v20 }
 0xa2b   : > { %v1745_v28 = vperm.slane %v1737_v38, %v3294_v58 }
 0xa2c   : > { %v1735_v50 = vsel %vm687_vm7, %v1734_v39, %v1715_v8 }
 0xa2d   : > { %v1741_v62 = vperm.slane %v1735_v50, %v3294_v58  ;;  %v1750_v8 = vrot.slane %v1745_v28, 4 }
 0xa8e   : > { %v2933_v21 = vpop.permute.xlu0 %2932 }
 0xa8f   : > { %v2935_v42 = vunpack.i.h.bf16 %v2933_v21  ;;  %v2934_v26 = vunpack.i.l.bf16 %v2933_v21  ;;  %v1710_v21 = vperm.slane %v1706_v6, %v3285_v47 }
 0xa91   : > { %v1784_v33 = vrot.slane %v2935_v42, 4  ;;  %v1772_v34 = vrot.slane %v2934_v26, 4  ;;  %v1725_v48 = vsel %vm687_vm7, %v1710_v21, %v1724_v40 }
 0xa96   : > { %v2938_v37 = vpop.permute.xlu0 %2937 }
 0xa97   : > { %v2940_v35 = vunpack.i.h.bf16 %v2938_v37  ;;  %v2939_v36 = vunpack.i.l.bf16 %v2938_v37 }
 0xa99   : > { %v1782_v43 = vrot.slane %v2940_v35, 4  ;;  %v1770_v44 = vrot.slane %v2939_v36, 4  ;;  %v1773_v45 = vsel %vm687_vm7, %v2939_v36, %v1772_v34  ;;  %v1785_v46 = vsel %vm687_vm7, %v2940_v35, %v1784_v33 }
 0xa9a   : > { %v1781_v51 = vperm.slane %v1773_v45, %v3285_v47  ;;  %v1793_v52 = vperm.slane %v1785_v46, %v3285_v47  ;;  %v1722_v45 = vrot.slane %v1710_v21, 4 }
 0xa9b   : > { %v1771_v54 = vsel %vm687_vm7, %v1770_v44, %v2934_v26  ;;  %v1783_v56 = vsel %vm687_vm7, %v1782_v43, %v2935_v42 }
 0xa9c   : > { %v1777_v59 = vperm.slane %v1771_v54, %v3285_v47  ;;  %v1789_v60 = vperm.slane %v1783_v56, %v3285_v47  ;;  %v1806_v55 = vrot.slane %v1793_v52, 4  ;;  %v1808_v61 = vrot.slane %v1781_v51, 4 }
 0xa9e   : > { %v1794_v1 = vrot.slane %v1789_v60, 4  ;;  %v1796_v2 = vrot.slane %v1777_v59, 4  ;;  %v1807_v4 = vsel %vm687_vm7, %v1806_v55, %v1781_v51  ;;  %v1809_v7 = vsel %vm687_vm7, %v1793_v52, %v1808_v61 }
 0xa9f   : > { %v1813_v10 = vperm.slane %v1807_v4, %v3294_v58  ;;  %v1817_v11 = vperm.slane %v1809_v7, %v3294_v58  ;;  %v1733_v55 = vperm.slane %v1725_v48, %v3294_v58  ;;  %v1723_v61 = vsel %vm687_vm7, %v1722_v45, %v1704_v5 }
 0xaa0   : > { %v1795_v12 = vsel %vm687_vm7, %v1794_v1, %v1777_v59  ;;  %v1797_v13 = vsel %vm687_vm7, %v1789_v60, %v1796_v2  ;;  %v1729_v6 = vperm.slane %v1723_v61, %v3294_v58 }
 0xaa1   : > { %v1801_v29 = vperm.slane %v1795_v12, %v3294_v58  ;;  %v1805_v14 = vperm.slane %v1797_v13, %v3294_v58  ;;  %v1822_v15 = vrot.slane %v1813_v10, 4  ;;  %v1824_v32 = vrot.slane %v1817_v11, 4 }
 0xaa3   : > { %v1818_v17 = vrot.slane %v1801_v29, 4  ;;  %v1820_v18 = vrot.slane %v1805_v14, 4  ;;  %v1825_v19 = vsel %vm687_vm7, 0.0, %v1824_v32  ;;  %v1837_v22 = vsel %vm687_vm7, %v1824_v32, %v1813_v10 }
 0xaa4   : > { %v1842_v23 = vrot.slane %v1825_v19, 4  ;;  %v1823_v25 = vsel %vm687_vm7, 0.0, %v1822_v15  ;;  %v1841_v42 = vperm.slane %v1837_v22, %v3285_v47  ;;  %v1746_v14 = vrot.slane %v1741_v62, 4 }
 0xaa5   : > { %v1821_v24 = vsel %vm687_vm7, 0.0, %v1820_v18  ;;  %v1826_v26 = vsel %vm687_vm7, %v1820_v18, %v1801_v29  ;;  %v1819_v37 = vsel %vm687_vm7, 0.0, %v1818_v17  ;;  %v1752_v15 = vrot.slane %v1733_v55, 4 }
 0xaa6   : > { %v1831_v27 = vrot.slane %v1821_v24, 4  ;;  %v1830_v30 = vperm.slane %v1826_v26, %v3285_v47  ;;  %v1843_v31 = vsel %vm687_vm7, %v1842_v23, %v1823_v25  ;;  %v1862_v34 = vrot.slane %v1841_v42, 4 }
 0xaa7   : > { %v1847_v33 = vperm.slane %v1843_v31, %v3285_v47  ;;  %v1751_v18 = vsel %vm687_vm7, %v1750_v8, %v1733_v55  ;;  %v1748_v19 = vrot.slane %v1729_v6, 4  ;;  %v1747_v21 = vsel %vm687_vm7, %v1746_v14, %v1729_v6 }
 0xaa8   : > { %v1832_v35 = vsel %vm687_vm7, %v1831_v27, %v1819_v37  ;;  %v1850_v36 = vrot.slane %v1830_v30, 4  ;;  %v1753_v40 = vsel %vm687_vm7, %v1745_v28, %v1752_v15  ;;  %v1756_v22 = vpack.c.bf16 %v1751_v18, %v1751_v18  ;;  %v3015_v27 = vld [vmem:[%s3239_s18] ss:$0 sm:$0xff]  ;;  %s3941_s18 = smov 64  }
 0xaa9   : > { %v1836_v41 = vperm.slane %v1832_v35, %v3285_v47  ;;  %v1863_v43 = vsel %vm687_vm7, %v1847_v33, %v1862_v34  ;;  %v1860_v44 = vrot.slane %v1847_v33, 4  ;;  %v1749_v23 = vsel %vm687_vm7, %v1741_v62, %v1748_v19 }
 0xaaa   : > { %v1871_v46 = vperm.slane %v1863_v43, %v3294_v58  ;;  %v1754_v24 = vpack.c.bf16 %v1747_v21, %v1747_v21  ;;  %v1757_v25 = vpack.c.bf16 %v1753_v40, %v1753_v40 }
 0xaab   : > { %v1851_v51 = vsel %vm687_vm7, %v1836_v41, %v1850_v36  ;;  %v1848_v52 = vrot.slane %v1836_v41, 4  ;;  %v1861_v53 = vsel %vm687_vm7, %v1860_v44, %v1841_v42  ;;  %v1755_v42 = vpack.c.bf16 %v1749_v23, %v1749_v23 }
 0xaac   : > { %v1859_v54 = vperm.slane %v1851_v51, %v3294_v58  ;;  %v1876_v56 = vrot.slane %v1871_v46, 4  ;;  %v1867_v59 = vperm.slane %v1861_v53, %v3294_v58 }
 0xaad   : > { %v1849_v60 = vsel %vm687_vm7, %v1848_v52, %v1830_v30 }
 0xaae   : > { %v1877_v63 = vsel %vm687_vm7, %v1876_v56, %v1859_v54  ;;  %v1855_v1 = vperm.slane %v1849_v60, %v3294_v58  ;;  %v1872_v2 = vrot.slane %v1867_v59, 4  ;;  %v1878_v4 = vrot.slane %v1859_v54, 4 }
 0xaaf   : > { %v1882_v7 = vpack.c.bf16 %v1877_v63, %v1877_v63 }
 0xab0   : > { %v1873_v9 = vsel %vm687_vm7, %v1872_v2, %v1855_v1  ;;  %v1879_v10 = vsel %vm687_vm7, %v1871_v46, %v1878_v4  ;;  %v1874_v11 = vrot.slane %v1855_v1, 4 }
 0xab1   : > { %v2052_v12 = vsel %vm1056_vm8, %v1882_v7, 0  ;;  %v1880_v5 = vpack.c.bf16 %v1873_v9, %v1873_v9  ;;  %v1883_v13 = vpack.c.bf16 %v1879_v10, %v1879_v10 }
 0xab2   : > { %2061 = vmatpush.bf16.xpose.msra.mxu1 %v2052_v12  ;;  %v1875_v29 = vsel %vm687_vm7, %v1867_v59, %v1874_v11 }
 0xab3   : > { %v2014_v32 = vsel %vm1056_vm8, %v1880_v5, 0  ;;  %v2071_v16 = vsel %vm1056_vm8, %v1883_v13, 0  ;;  %v1881_v17 = vpack.c.bf16 %v1875_v29, %v1875_v29 }
 0xab4   : > { %2023 = vmatpush.bf16.xpose.msrb.mxu3 %v2014_v32  ;;  %2080 = vmatpush.bf16.xpose.msra.mxu2 %v2071_v16 }
 0xab5   : > { %v2033_v20 = vsel %vm1056_vm8, %v1881_v17, 0 }
 0xab6   : > { %2042 = vmatpush.bf16.xpose.msrb.mxu0 %v2033_v20 }
 0xab9   : > { %2752 = vmatmul.msk.bf16.vlgmr.msra.gmra.mxu1 %vm1056_vm8, %v1756_v22 }
 0xabb   : > { %2750 = vmatmul.msk.bf16.vlgmr.msrb.gmra.mxu3 %vm1056_vm8, %v1754_v24  ;;  %2753 = vmatmul.msk.bf16.vlgmr.msra.gmra.mxu2 %vm1056_vm8, %v1757_v25 }
 0xabd   : > { %2751 = vmatmul.msk.bf16.vlgmr.msrb.gmra.mxu0 %vm1056_vm8, %v1755_v42 }
 0xb36   : > { %v2063_v26 = vpop.f32.mrf.mxu1 }
 0xb37   : > { %v2064_v30 = vadd.f32 %v3015_v27, %v2063_v26 }
 0xb39   : > { %v2092_v31 = vsel %vm1056_vm8, %v2064_v30, -inf }
 0xb3a   : > { %2093 = vmax.xlane.f32.xlu2 %v2092_v31  ;;  %v2044_v39 = vpop.f32.mrf.mxu0 }
 0xb3b   : > { %v2045_v37 = vadd.f32 %v3015_v27, %v2044_v39 }
 0xb3d   : > { %v2089_v33 = vsel %vm1056_vm8, %v2045_v37, -inf }
 0xb3e   : > { %v2065_v34 = vpop.f32.mrf.mxu1  ;;  %v2082_v35 = vpop.f32.mrf.mxu2  ;;  %2090 = vmax.xlane.f32.xlu1 %v2089_v33 }
 0xb3f   : > { %v2083_v36 = vadd.f32 %v3015_v27, %v2082_v35  ;;  %v2025_v38 = vpop.f32.mrf.mxu3 }
 0xb40   : > { %v2026_v41 = vadd.f32 %v3015_v27, %v2025_v38 }
 0xb41   : > { %v2095_v43 = vsel %vm1056_vm8, %v2083_v36, -inf }
 0xb42   : > { %2096 = vmax.xlane.f32.xlu0 %v2095_v43  ;;  %v2046_v44 = vpop.f32.mrf.mxu0  ;;  %v2086_v45 = vsel %vm1056_vm8, %v2026_v41, -inf }
 0xb46   : > { %v2084_v46 = vpop.f32.mrf.mxu2  ;;  %2087 = vmax.xlane.f32.xlu1 %v2086_v45 }
 0xb47   : > { %v2027_v48 = vpop.f32.mrf.mxu3 }
 0xb56   : > { %2942 = vrot.lane.b32.xlu0 %v3575_v0, %s3941_s18 }
 0xb5f   : > { %2947 = vrot.lane.b32.xlu1 %v3579_v3, %s3941_s18  ;;  %s2591_s18 = scalar_lea.hbm %s3910_s17, %s3207_s28 }
 0xb60   : > { %s2595_s29 = sshll.u32 %s2591_s18, 4  ;;  %s2596_s29 = int_to_ptr.hbm [resolvable:$true] %s2595_s29 }
 0xb61   : > { %s3030_s21 = sshra.s32 %s2596_s29, 4  ;;  %s3031_s21 = int_to_ptr.hbm [resolvable:$true] %s3030_s21 }
 0xb62   : > { %s3032_s22 = scalar_lea.hbm %s3031_s21, 1  ;;  %p3037_p0 = scmp.lt.s32.totalorder %s3031_s21, %s3910_s17 }
 0xb63   : > { %p3033_p11 = scmp.ne.s32.totalorder %s3031_s21, %s3032_s22  ;;  %p3038_p1 = scmp.lt.s32.totalorder %s3036_s19, %s3032_s22 }
 0xb65   : > { %p3034_p12 = pnand %p3033_p11, %p3224_p5  ;;  %p3039_p2 = por %p3038_p1, %p3037_p0 }
 0xb67   : > { %p3035_p13 = pneg %p3034_p12 }
 0xb69   : > { %p3040_p3 = pnand %p3039_p2, %p3035_p13 }
 0xbad   : > { %v2094_v50 = vpop.xlane.xlu2 %2093 }
 0xbae   : > { %v2100_v51 = vsub.f32 %v2064_v30, %v2094_v50 }
 0xbb0   : > { %v2106_v52 = vmul.f32 1.442695, %v2100_v51 }
 0xbb1   : > { %v2091_v53 = vpop.xlane.xlu1 %2090 }
 0xbb2   : > { %2993 = vpow2.f32 %v2106_v52  ;;  %v2099_v3 = vsub.f32 %v2045_v37, %v2091_v53 }
 0xbb4   : > { %v2104_v1 = vmul.f32 1.442695, %v2099_v3 }
 0xbb5   : > { %v2097_v54 = vpop.xlane.xlu0 %2096 }
 0xbb6   : > { %v2101_v55 = vsub.f32 %v2083_v36, %v2097_v54 }
 0xbb8   : > { %v3680_v28 = vpop.eup %2993  ;;  %v2108_v0 = vmul.f32 1.442695, %v2101_v55 }
 0xbb9   : > { %v2088_v56 = vpop.xlane.xlu1 %2087  ;;  %v2116_v59 = vsel %vm1056_vm8, %v3680_v28, 0.0 }
 0xbba   : > { %v2098_v60 = vsub.f32 %v2026_v41, %v2088_v56  ;;  %2117 = vadd.xlane.f32.xlu0 %v2116_v59 }
 0xbbc   : > { %v2102_v61 = vmul.f32 1.442695, %v2098_v60 }
 0xbbe   : > { %2995 = vpow2.f32 %v2102_v61 }
 0xbbf   : > { %2997 = vpow2.f32 %v2108_v0 }
 0xbc0   : > { %2999 = vpow2.f32 %v2104_v1 }
 0xbc4   : > { %v3684_v62 = vpop.eup %2995 }
 0xbc5   : > { %v2110_v63 = vsel %vm1056_vm8, %v3684_v62, 0.0  ;;  %v3688_v2 = vpop.eup %2997 }
 0xbc6   : > { %2111 = vadd.xlane.f32.xlu2 %v2110_v63  ;;  %v2119_v7 = vsel %vm1056_vm8, %v3688_v2, 0.0  ;;  %v3692_v11 = vpop.eup %2999 }
 0xbc7   : > { %v2113_v18 = vsel %vm1056_vm8, %v3692_v11, 0.0 }
 0xbc8   : > { %v2943_v4 = vpop.permute.xlu0 %2942 }
 0xbc9   : > { %v2945_v8 = vunpack.i.h.bf16 %v2943_v4  ;;  %v2944_v9 = vunpack.i.l.bf16 %v2943_v4 }
 0xbcb   : > { %v1910_v6 = vrot.slane %v2945_v8, 4  ;;  %v1898_v12 = vrot.slane %v2944_v9, 4 }
 0xbce   : > { %2120 = vadd.xlane.f32.xlu2 %v2119_v7 }
 0xbd1   : > { %v2948_v10 = vpop.permute.xlu1 %2947 }
 0xbd2   : > { %v2950_v5 = vunpack.i.h.bf16 %v2948_v10  ;;  %v2949_v13 = vunpack.i.l.bf16 %v2948_v10 }
 0xbd4   : > { %v1908_v29 = vrot.slane %v2950_v5, 4  ;;  %v1911_v14 = vsel %vm687_vm7, %v2950_v5, %v1910_v6  ;;  %v1896_v15 = vrot.slane %v2949_v13, 4  ;;  %v1899_v32 = vsel %vm687_vm7, %v2949_v13, %v1898_v12 }
 0xbd5   : > { %v1919_v16 = vperm.slane %v1911_v14, %v3285_v47  ;;  %v1907_v17 = vperm.slane %v1899_v32, %v3285_v47 }
 0xbd6   : > { %v1909_v19 = vsel %vm687_vm7, %v1908_v29, %v2945_v8  ;;  %v1897_v20 = vsel %vm687_vm7, %v1896_v15, %v2944_v9  ;;  %2114 = vadd.xlane.f32.xlu2 %v2113_v18 }
 0xbd7   : > { %v1915_v21 = vperm.slane %v1909_v19, %v3285_v47  ;;  %v1932_v40 = vrot.slane %v1919_v16, 4  ;;  %v1903_v22 = vperm.slane %v1897_v20, %v3285_v47  ;;  %v1934_v23 = vrot.slane %v1907_v17, 4 }
 0xbd9   : > { %v1920_v24 = vrot.slane %v1915_v21, 4  ;;  %v1922_v25 = vrot.slane %v1903_v22, 4  ;;  %v1933_v42 = vsel %vm687_vm7, %v1932_v40, %v1907_v17  ;;  %v1935_v26 = vsel %vm687_vm7, %v1919_v16, %v1934_v23 }
 0xbda   : > { %v1939_v27 = vperm.slane %v1933_v42, %v3294_v58  ;;  %v1943_v30 = vperm.slane %v1935_v26, %v3294_v58 }
 0xbdb   : > { %v1921_v31 = vsel %vm687_vm7, %v1920_v24, %v1903_v22  ;;  %v1923_v39 = vsel %vm687_vm7, %v1915_v21, %v1922_v25 }
 0xbdc   : > { %v1927_v37 = vperm.slane %v1921_v31, %v3294_v58  ;;  %v1931_v33 = vperm.slane %v1923_v39, %v3294_v58  ;;  %v1948_v34 = vrot.slane %v1939_v27, 4  ;;  %v1950_v35 = vrot.slane %v1943_v30, 4 }
 0xbde   : > { %v1944_v36 = vrot.slane %v1927_v37, 4  ;;  %v1946_v38 = vrot.slane %v1931_v33, 4  ;;  %v1951_v41 = vsel %vm687_vm7, 0.0, %v1950_v35  ;;  %v1963_v43 = vsel %vm687_vm7, %v1950_v35, %v1939_v27 }
 0xbdf   : > { %v1968_v44 = vrot.slane %v1951_v41, 4  ;;  %v1949_v46 = vsel %vm687_vm7, 0.0, %v1948_v34  ;;  %v1967_v48 = vperm.slane %v1963_v43, %v3285_v47 }
 0xbe0   : > { %v1947_v45 = vsel %vm687_vm7, 0.0, %v1946_v38  ;;  %v1952_v50 = vsel %vm687_vm7, %v1946_v38, %v1927_v37  ;;  %v1945_v54 = vsel %vm687_vm7, 0.0, %v1944_v36 }
 0xbe1   : > { %v1957_v51 = vrot.slane %v1947_v45, 4  ;;  %v1956_v52 = vperm.slane %v1952_v50, %v3285_v47  ;;  %v1969_v53 = vsel %vm687_vm7, %v1968_v44, %v1949_v46  ;;  %v1988_v59 = vrot.slane %v1967_v48, 4 }
 0xbe2   : > { %v1973_v56 = vperm.slane %v1969_v53, %v3285_v47 }
 0xbe3   : > { %v1958_v60 = vsel %vm687_vm7, %v1957_v51, %v1945_v54  ;;  %v1976_v55 = vrot.slane %v1956_v52, 4 }
 0xbe4   : > { %v1962_v61 = vperm.slane %v1958_v60, %v3285_v47  ;;  %v1989_v0 = vsel %vm687_vm7, %v1973_v56, %v1988_v59  ;;  %v1986_v3 = vrot.slane %v1973_v56, 4 }
 0xbe5   : > { %v1997_v63 = vperm.slane %v1989_v0, %v3294_v58 }
 0xbe6   : > { %v1977_v1 = vsel %vm687_vm7, %v1962_v61, %v1976_v55  ;;  %v1974_v4 = vrot.slane %v1962_v61, 4  ;;  %v1987_v7 = vsel %vm687_vm7, %v1986_v3, %v1967_v48 }
 0xbe7   : > { %v1985_v8 = vperm.slane %v1977_v1, %v3294_v58  ;;  %v2002_v9 = vrot.slane %v1997_v63, 4  ;;  %v1993_v10 = vperm.slane %v1987_v7, %v3294_v58 }
 0xbe8   : > { %v1975_v6 = vsel %vm687_vm7, %v1974_v4, %v1956_v52 }
 0xbe9   : > { %v2003_v12 = vsel %vm687_vm7, %v2002_v9, %v1985_v8  ;;  %v1981_v5 = vperm.slane %v1975_v6, %v3294_v58  ;;  %v1998_v13 = vrot.slane %v1993_v10, 4  ;;  %v2004_v29 = vrot.slane %v1985_v8, 4 }
 0xbea   : > { %v2008_v14 = vpack.c.bf16 %v2003_v12, %v2003_v12 }
 0xbeb   : > { %v1999_v15 = vsel %vm687_vm7, %v1998_v13, %v1981_v5  ;;  %v2005_v32 = vsel %vm687_vm7, %v1997_v63, %v2004_v29  ;;  %v2000_v16 = vrot.slane %v1981_v5, 4 }
 0xbec   : > { %v2176_v17 = vsel %vm1184_vm9, %v2008_v14, 0  ;;  %v2006_v18 = vpack.c.bf16 %v1999_v15, %v1999_v15  ;;  %v2009_v19 = vpack.c.bf16 %v2005_v32, %v2005_v32 }
 0xbed   : > { %2185 = vmatpush.bf16.msrb.mxu1 %v2176_v17  ;;  %v2001_v20 = vsel %vm687_vm7, %v1993_v10, %v2000_v16 }
 0xbee   : > { %v2138_v21 = vsel %vm1184_vm9, %v2006_v18, 0  ;;  %v2195_v40 = vsel %vm1184_vm9, %v2009_v19, 0  ;;  %v2007_v22 = vpack.c.bf16 %v2001_v20, %v2001_v20 }
 0xbef   : > { %2147 = vmatpush.bf16.msra.mxu3 %v2138_v21  ;;  %2204 = vmatpush.bf16.msrb.mxu2 %v2195_v40 }
 0xbf0   : > { %v2157_v23 = vsel %vm1184_vm9, %v2007_v22, 0 }
 0xbf1   : > { %2166 = vmatpush.bf16.msra.mxu0 %v2157_v23 }
 0xc2d   : > { %v2118_v24 = vpop.xlane.xlu0 %2117 }
 0xc2e   : > { %3001 = vrcp.f32 %v2118_v24 }
 0xc34   : > { %v3002_v25 = vpop.eup %3001 }
 0xc35   : > { %v2128_v42 = vmul.f32 %v3002_v25, %v3680_v28 }
 0xc37   : > { %v2132_v26 = vpack.c.bf16 %v2128_v42, %v2128_v42 }
 0xc39   : > { %v2112_v27 = vpop.xlane.xlu2 %2111  ;;  %2756 = vmatmul.msk.bf16.vlgmr.msrb.gmra.mxu1 %vm1056_vm8, %v2132_v26 }
 0xc3a   : > { %3003 = vrcp.f32 %v2112_v27 }
 0xc40   : > { %v3004_v30 = vpop.eup %3003 }
 0xc41   : > { %v2126_v31 = vmul.f32 %v3004_v30, %v3684_v62  ;;  %v2121_v39 = vpop.xlane.xlu2 %2120 }
 0xc42   : > { %3005 = vrcp.f32 %v2121_v39 }
 0xc43   : > { %v2130_v37 = vpack.c.bf16 %v2126_v31, %v2126_v31 }
 0xc45   : > { %2754 = vmatmul.msk.bf16.vlgmr.msra.gmra.mxu3 %vm1056_vm8, %v2130_v37 }
 0xc48   : > { %v3006_v33 = vpop.eup %3005 }
 0xc49   : > { %v2129_v34 = vmul.f32 %v3006_v33, %v3688_v2  ;;  %v2115_v35 = vpop.xlane.xlu2 %2114 }
 0xc4a   : > { %3007 = vrcp.f32 %v2115_v35 }
 0xc4b   : > { %v2133_v36 = vpack.c.bf16 %v2129_v34, %v2129_v34 }
 0xc4d   : > { %2757 = vmatmul.msk.bf16.vlgmr.msrb.gmra.mxu2 %vm1056_vm8, %v2133_v36 }
 0xc50   : > { %v3008_v28 = vpop.eup %3007 }
 0xc51   : > { %v2127_v38 = vmul.f32 %v3008_v28, %v3692_v11 }
 0xc53   : > { %v2131_v41 = vpack.c.bf16 %v2127_v38, %v2127_v38 }
 0xc55   : > { %2755 = vmatmul.msk.bf16.vlgmr.msra.gmra.mxu0 %vm1056_vm8, %v2131_v41 }
 0xcb6   : > { %v2187_v62 = vpop.f32.mrf.mxu1 }
 0xcb7   : > { %v2210_v45 = vrot.slane %v2187_v62, 4 }
 0xcbe   : > { %v2189_v43 = vpop.f32.mrf.mxu1 }
 0xcc8   : > { %v2149_v44 = vpop.f32.mrf.mxu3 }
 0xcc9   : > { %v2212_v46 = vrot.slane %v2149_v44, 4  ;;  %v2211_v48 = vsel %vm687_vm7, %v2210_v45, %v2149_v44 }
 0xcca   : > { %v2217_v50 = vperm.slane %v2211_v48, %v3285_v47 }
 0xccb   : > { %v2213_v2 = vsel %vm687_vm7, %v2187_v62, %v2212_v46 }
 0xccc   : > { %v2221_v54 = vperm.slane %v2213_v2, %v3285_v47  ;;  %v2236_v60 = vrot.slane %v2217_v50, 4 }
 0xcce   : > { %v2248_v0 = vrot.slane %v2221_v54, 4 }
 0xcd0   : > { %v2151_v51 = vpop.f32.mrf.mxu3  ;;  %v2206_v52 = vpop.f32.mrf.mxu2 }
 0xcd1   : > { %v2222_v53 = vrot.slane %v2206_v52, 4 }
 0xcd2   : > { %v2168_v11 = vpop.f32.mrf.mxu0 }
 0xcd3   : > { %v2223_v56 = vsel %vm687_vm7, %v2222_v53, %v2168_v11  ;;  %v2224_v59 = vrot.slane %v2168_v11, 4 }
 0xcd4   : > { %v2229_v55 = vperm.slane %v2223_v56, %v3285_v47 }
 0xcd5   : > { %v2225_v61 = vsel %vm687_vm7, %v2206_v52, %v2224_v59  ;;  %v2843_v52 = vld [vmem:[%s3898_s5 + $0x10] sm:$0xff] }
 0xcd6   : > { %v2233_v3 = vperm.slane %v2225_v61, %v3285_v47  ;;  %v2234_v63 = vrot.slane %v2229_v55, 4  ;;  %v2237_v1 = vsel %vm687_vm7, %v2229_v55, %v2236_v60  ;;  %v2962_v61 = vld [vmem:[%s3899_s6 + $0x1] ss:$0 sm:$0xff] }
 0xcd7   : > { %v2245_v4 = vperm.slane %v2237_v1, %v3294_v58 }
 0xcd8   : > { %v2235_v7 = vsel %vm687_vm7, %v2234_v63, %v2217_v50  ;;  %v2246_v8 = vrot.slane %v2233_v3, 4  ;;  %v2249_v9 = vsel %vm687_vm7, %v2233_v3, %v2248_v0  ;;  %v2208_v10 = vpop.f32.mrf.mxu2 }
 0xcd9   : > { %v2241_v6 = vperm.slane %v2235_v7, %v3294_v58  ;;  %v2257_v12 = vperm.slane %v2249_v9, %v3294_v58  ;;  %v2260_v5 = vrot.slane %v2245_v4, 4 }
 0xcda   : > { %v2247_v13 = vsel %vm687_vm7, %v2246_v8, %v2221_v54  ;;  %v2170_v29 = vpop.f32.mrf.mxu0 }
 0xcdb   : > { %v2253_v14 = vperm.slane %v2247_v13, %v3294_v58  ;;  %v2258_v15 = vrot.slane %v2241_v6, 4  ;;  %v2261_v32 = vsel %vm687_vm7, 0.0, %v2260_v5  ;;  %v2264_v16 = vrot.slane %v2257_v12, 4  ;;  %v2846_v12 = vld [vmem:[%s3902_s9 + $0x18] sm:$0xff] }
 0xcdc   : > { %v2266_v17 = vsel %vm687_vm7, %v2260_v5, %v2241_v6  ;;  %v2271_v18 = vrot.slane %v2261_v32, 4  ;;  %2441 = vmatpush.bf16.msrb.mxu0 %v2846_v12 }
 0xcdd   : > { %v2259_v19 = vsel %vm687_vm7, 0.0, %v2258_v15  ;;  %v2262_v20 = vrot.slane %v2253_v14, 4  ;;  %v2265_v21 = vsel %vm687_vm7, 0.0, %v2264_v16  ;;  %v2270_v40 = vperm.slane %v2266_v17, %v3285_v47 }
 0xcde   : > { %v2282_v22 = vrot.slane %v2265_v21, 4  ;;  %v2272_v23 = vsel %vm687_vm7, %v2271_v18, %v2259_v19  ;;  %v2277_v24 = vsel %vm687_vm7, %v2264_v16, %v2253_v14  ;;  %v2963_v19 = vld [vmem:[%s3900_s7 + $0x1] ss:$0 sm:$0xff] }
 0xcdf   : > { %v2263_v25 = vsel %vm687_vm7, 0.0, %v2262_v20  ;;  %v2276_v42 = vperm.slane %v2272_v23, %v3285_v47  ;;  %v2281_v26 = vperm.slane %v2277_v24, %v3285_v47  ;;  %v2290_v27 = vrot.slane %v2270_v40, 4  ;;  %v2964_v21 = vld [vmem:[%s3901_s8 + $0x1] ss:$0 sm:$0xff] }
 0xce0   : > { %v2283_v30 = vsel %vm687_vm7, %v2282_v22, %v2263_v25  ;;  %v2850_v25 = vld [vmem:[%s3904_s11 + $0x38] sm:$0xff] }
 0xce1   : > { %v2287_v31 = vperm.slane %v2283_v30, %v3285_v47  ;;  %v2302_v39 = vrot.slane %v2281_v26, 4  ;;  %v2288_v37 = vrot.slane %v2276_v42, 4  ;;  %v2291_v33 = vsel %vm687_vm7, %v2276_v42, %v2290_v27  ;;  %2503 = vmatpush.bf16.msra.mxu1 %v2850_v25  ;;  %v2849_v42 = vld [vmem:[%s3904_s11 + $0x30] sm:$0xff]  ;;  %v2847_v27 = vld [vmem:[%s3904_s11 + $0x20] sm:$0xff] }
 0xce2   : > { %v2299_v62 = vperm.slane %v2291_v33, %v3294_v58  ;;  %v2965_v30 = vld [vmem:[%s3903_s10 + $0x1] ss:$0 sm:$0xff] }
 0xce3   : > { %v2303_v34 = vsel %vm687_vm7, %v2287_v31, %v2302_v39  ;;  %v2289_v35 = vsel %vm687_vm7, %v2288_v37, %v2270_v40  ;;  %v2300_v36 = vrot.slane %v2287_v31, 4 }
 0xce4   : > { %v2311_v28 = vperm.slane %v2303_v34, %v3294_v58  ;;  %v2295_v38 = vperm.slane %v2289_v35, %v3294_v58  ;;  %v2318_v50 = vrot.slane %v2299_v62, 4 }
 0xce5   : > { %v2301_v41 = vsel %vm687_vm7, %v2300_v36, %v2281_v26  ;;  %2504 = vmatpush.bf16.msra.mxu1 %v2849_v42  ;;  %v2848_v26 = vld [vmem:[%s3904_s11 + $0x28] sm:$0xff] }
 0xce6   : > { %v2316_v43 = vrot.slane %v2311_v28, 4  ;;  %v2307_v47 = vperm.slane %v2301_v41, %v3294_v58  ;;  %v2314_v44 = vrot.slane %v2295_v38, 4  ;;  %v2319_v51 = vsel %vm687_vm7, %v2311_v28, %v2318_v50  ;;  %v2844_v58 = vld [vmem:[%s3898_s5 + $0x18] sm:$0xff] }
 0xce7   : > { %2367 = vmatpush.bf16.msrb.mxu3 %v2844_v58 }
 0xce8   : > { %v2317_v45 = vsel %vm687_vm7, %v2316_v43, %v2299_v62  ;;  %v2312_v46 = vrot.slane %v2307_v47, 4  ;;  %v2315_v48 = vsel %vm687_vm7, %v2307_v47, %v2314_v44  ;;  %v2966_v44 = vld [vmem:[%s3905_s12 + $0x1] ss:$0 sm:$0xff] }
 0xce9   : > { %2325 = vrot.lane.b32.xlu2 %v2317_v45, %s3942_s30  ;;  %2321 = vrot.lane.b32.xlu1 %v2315_v48, %s3943_s26 }
 0xcea   : > { %v2313_v2 = vsel %vm687_vm7, %v2312_v46, %v2295_v38  ;;  %2505 = vmatpush.bf16.msra.mxu1 %v2848_v26 }
 0xceb   : > { %2368 = vmatpush.bf16.msrb.mxu3 %v2843_v52 }
 0xcee   : > { %2506 = vmatpush.bf16.msra.mxu1 %v2847_v27 }
 0xcf1   : > { %2329 = vrot.lane.b32.xlu1 %v2319_v51, %s3944_s0  ;;  %s3946_s0 = sld [smem:[#allocation14_spill]] }
 0xd43   : > { %v2326_v11 = vpop.permute.xlu2 %2325 }
 0xd5b   : > { %v2322_v53 = vpop.permute.xlu1 %2321 }
 0xd5c   : > { %v2332_v54 = vsel %vm1056_vm8, %v2313_v2, %v2322_v53 }
 0xd5d   : > { %v2333_v59 = vsel %vm1381_vm10, %v2332_v54, %v2326_v11  ;;  %v2852_v11 = vld [vmem:[%s3908_s15 + $0x8] sm:$0xff] }
 0xd5e   : > { %2574 = vmatpush.bf16.msra.mxu2 %v2852_v11 }
 0xd63   : > { %v2330_v56 = vpop.permute.xlu1 %2329 }
 0xd64   : > { %v2334_v60 = vsel %vm1383_vm11, %v2333_v59, %v2330_v56  ;;  %v2851_v56 = vld [vmem:[%s3908_s15] sm:$0xff] }
 0xd65   : > { %v2335_v55 = vpack.c.bf16 %v2334_v60, %v2334_v60  ;;  %2575 = vmatpush.bf16.msra.mxu2 %v2851_v56 }
 0xd67   : > { %2771 = vmatmul.msk.bf16.vlgmr.msrb.gmra.mxu3 %vm659_vm6, %v2335_v55 }
 0xdea   : > { %v2370_v0 = vpop.f32.mrf.mxu3 }
 0xdeb   : > { %v2371_v3 = vadd.f32 %v2962_v61, %v2370_v0 }
 0xded   : > { %v2374_v63 = vadd.f32 %v2371_v3, %v3564_v57  ;;  %v2845_v57 = vld [vmem:[%s3902_s9 + $0x10] sm:$0xff] }
 0xdee   : > { %2442 = vmatpush.bf16.msrb.mxu0 %v2845_v57  ;;  %v2552_v57 = vld [vmem:[%s3946_s0] sm:$0x1] }
 0xdef   : > { %v2379_v1 = vsel %vm659_vm6, %v2374_v63, 0.0 }
 0xdf0   : > { %2380 = vadd.xlane.f32.xlu1 %v2379_v1 }
 0xdf2   : > { %v2372_v4 = vpop.f32.mrf.mxu3 }
 0xe63   : > { %v2381_v7 = vpop.xlane.xlu1 %2380 }
 0xe64   : > { %v2382_v8 = vmul.f32 %v2381_v7, %v3511_v49  ;;  %v2967_v7 = vld [vmem:[%s3906_s13 + $0x1] ss:$0 sm:$0xff] }
 0xe66   : > { %v2383_v9 = vsub.f32 %v2374_v63, %v2382_v8 }
 0xe68   : > { %v2384_v10 = vmul.f32 %v2383_v9, %v2383_v9 }
 0xe6a   : > { %v2385_v6 = vsel %vm659_vm6, %v2384_v10, 0.0 }
 0xe6b   : > { %2386 = vadd.xlane.f32.xlu2 %v2385_v6 }
 0xede   : > { %v2387_v5 = vpop.xlane.xlu2 %2386 }
 0xedf   : > { %v2388_v13 = vmul.f32 %v2387_v5, %v3511_v49 }
 0xee1   : > { %v2389_v29 = vadd.f32 1e-12, %v2388_v13 }
 0xee3   : > { %3009 = vrsqrt.f32 %v2389_v29  ;;  %vm2396_vm5 = vweird.f32 %v2389_v29 }
 0xee9   : > { %v3010_v14 = vpop.eup %3009 }
 0xeea   : > { %v2391_v15 = vmul.f32 %v3010_v14, %v2389_v29  ;;  %vm2397_vm4 = vweird.f32 %v3010_v14 }
 0xeeb   : > { %vm2398_vm7 = vmor %vm2396_vm5, %vm2397_vm4 }
 0xeec   : > { %v2392_v32 = vmul.f32 %v3010_v14, %v2391_v15 }
 0xeee   : > { %v2393_v16 = vmul.f32 0.5, %v2392_v32 }
 0xef0   : > { %v2394_v17 = vsub.f32 1.5, %v2393_v16 }
 0xef2   : > { %v2395_v18 = vmul.f32 %v3010_v14, %v2394_v17 }
 0xef4   : > { %v2399_v20 = vsel %vm2398_vm7, %v3010_v14, %v2395_v18 }
 0xef5   : > { %v2400_v40 = vmul.f32 %v2399_v20, %v2383_v9 }
 0xef7   : > { %v2404_v22 = vmul.f32 %v2963_v19, %v2400_v40 }
 0xef9   : > { %v2408_v23 = vadd.f32 %v2964_v21, %v2404_v22 }
 0xefb   : > { %v2409_v24 = vpack.c.bf16 %v2408_v23, %v2408_v23 }
 0xefd   : > { %2787 = vmatmul.msk.bf16.vlgmr.msrb.gmra.mxu0 %vm659_vm6, %v2409_v24 }
 0xf7a   : > { %v2444_v31 = vpop.f32.mrf.mxu0 }
 0xf7b   : > { %v2445_v39 = vadd.f32 %v2965_v30, %v2444_v31 }
 0xf7d   : > { %v2449_v37 = vmul.f32 0.044715, %v2445_v39  ;;  %v2448_v41 = vmul.f32 0.5, %v2445_v39 }
 0xf7f   : > { %v2450_v33 = vmul.f32 %v2449_v37, %v2445_v39 }
 0xf81   : > { %v2451_v34 = vmul.f32 %v2450_v33, %v2445_v39 }
 0xf82   : > { %v2446_v35 = vpop.f32.mrf.mxu0 }
 0xf83   : > { %v2452_v36 = vadd.f32 %v2451_v34, %v2445_v39 }
 0xf85   : > { %v2453_v28 = vmul.f32 0.7978846, %v2452_v36 }
 0xf87   : > { %3011 = vtanh.f32 %v2453_v28 }
 0xf8d   : > { %v3012_v38 = vpop.eup %3011 }
 0xf8e   : > { %v2455_v62 = vadd.f32 1.0, %v3012_v38 }
 0xf90   : > { %v2456_v43 = vmul.f32 %v2455_v62, %v2448_v41 }
 0xf92   : > { %v2457_v47 = vpack.c.bf16 %v2456_v43, %v2456_v43 }
 0xf94   : > { %2813 = vmatmul.msk.bf16.vlgmr.msra.gmra.mxu1 %vm1545_vm0, %v2457_v47 }
0x1011   : > { %v2508_v45 = vpop.f32.mrf.mxu1 }
0x1012   : > { %v2509_v46 = vadd.f32 %v2966_v44, %v2508_v45 }
0x1014   : > { %v2512_v48 = vadd.f32 %v2509_v46, %v2408_v23 }
0x1016   : > { %v2517_v2 = vsel %vm659_vm6, %v2512_v48, 0.0 }
0x1017   : > { %2518 = vadd.xlane.f32.xlu0 %v2517_v2 }
0x1019   : > { %v2510_v50 = vpop.f32.mrf.mxu1 }
0x108a   : > { %v2519_v51 = vpop.xlane.xlu0 %2518 }
0x108b   : > { %v2520_v58 = vmul.f32 %v2519_v51, %v3511_v49 }
0x108d   : > { %v2521_v52 = vsub.f32 %v2512_v48, %v2520_v58 }
0x108f   : > { %v2522_v53 = vmul.f32 %v2521_v52, %v2521_v52 }
0x1091   : > { %v2523_v54 = vsel %vm659_vm6, %v2522_v53, 0.0 }
0x1092   : > { %2524 = vadd.xlane.f32.xlu0 %v2523_v54 }
0x1105   : > { %v2525_v59 = vpop.xlane.xlu0 %2524 }
0x1106   : > { %v2526_v60 = vmul.f32 %v2525_v59, %v3511_v49  ;;  %v2968_v49 = vld [vmem:[%s3907_s14 + $0x1] ss:$0 sm:$0xff] }
0x1108   : > { %v2527_v55 = vadd.f32 1e-12, %v2526_v60 }
0x110a   : > { %3013 = vrsqrt.f32 %v2527_v55  ;;  %vm2534_vm9 = vweird.f32 %v2527_v55 }
0x1110   : > { %v3014_v61 = vpop.eup %3013 }
0x1111   : > { %v2529_v0 = vmul.f32 %v3014_v61, %v2527_v55  ;;  %vm2535_vm8 = vweird.f32 %v3014_v61 }
0x1112   : > { %vm2536_vm10 = vmor %vm2534_vm9, %vm2535_vm8 }
0x1113   : > { %v2530_v3 = vmul.f32 %v3014_v61, %v2529_v0 }
0x1115   : > { %v2531_v63 = vmul.f32 0.5, %v2530_v3 }
0x1117   : > { %v2532_v1 = vsub.f32 1.5, %v2531_v63 }
0x1119   : > { %v2533_v4 = vmul.f32 %v3014_v61, %v2532_v1 }
0x111b   : > { %v2537_v8 = vsel %vm2536_vm10, %v3014_v61, %v2533_v4 }
0x111c   : > { %v2538_v9 = vmul.f32 %v2537_v8, %v2521_v52 }
0x111e   : > { %v2542_v10 = vmul.f32 %v2967_v7, %v2538_v9 }
0x1120   : > { %v2546_v6 = vadd.f32 %v2968_v49, %v2542_v10 }
0x1122   : > { %v2547_v12 = vpack.c.bf16 %v2546_v6, %v2546_v6 }
0x1124   : > { %2824 = vmatmul.msk.bf16.vlgmr.msra.gmra.mxu2 %vm659_vm6, %v2547_v12 }
0x11a7   : > { %v2577_v5 = vpop.f32.mrf.mxu2 }
0x11a8   : > { %v2578_v13 = vadd.f32 %v2577_v5, %v2552_v57 }
0x11aa   : > { %2581 = vst [vmem:[%s549_s27] sm:$0x1] %v2578_v13 }
0x11ab   : > { %3043 = shalt.err (!%p3040_p3)
}
0x11ac   : > { %2853 = dma.vmem_to_hbm [thread:$0]  (%p3224_p5), %s2594_s1, 16, %s2596_s29, %s2583_s20  }
0x11af   : > { %v2579_v29 = vpop.f32.mrf.mxu2 }
0x11b0 PF: > { %s3947_s23 = sld [smem:[#allocation7_spill]] }
0x11b1   : > { %s3948_s18 = sld [smem:[#allocation5_spill]] }
0x11b6   : > { %p2859_p4 = scmp.ge.s32.totalorder %s3947_s23, 2 }
0x11b7   : > { %s2607_s27 = sand.u32 1, %s3948_s18  }
0x11b8   : > { %p2856_p7 = pnand %p2859_p4, %p3228_p6  ;;  %s2608_s28 = scalar_lea.sflag [#allocation3], %s2607_s27 }
0x11ba   : > { %p2857_p8 = pneg %p2856_p7 }
0x11bc   : > { %3061 = dma.done.wait (%p2857_p8), %s2608_s28, 16  }
0x11bd   : > { %3063 = vsyncadd (%p2857_p8), %s2608_s28, 4294967280  ;;  %s3950_s27 = sld [smem:[#allocation8_spill]]  ;;  %s3953_s24 = smov %s3070_s25 }
0x11be   : > { %s3951_s21 = sld [smem:[#allocation6_spill]] }
0x11bf   : > { %s3952_s26 = sld [smem:[#allocation9_spill]] }
0x11c3   : > { %p27_p9 = scmp.ge.s32.totalorder %s3950_s27, 4  }
0x11c4   : > { %s3954_s25 = smov %s3951_s21 }
0x11c5   :  { %29 = sbr.rel (!%p27_p9) target bundleno = 7 (0x7), region = 138 }
0x11ca   :  { %2613 = vsyncpa [#allocation3], 1 }
0x11cb   :  { %2615 = vsyncpa [#allocation3 + $0x1], 1 }

</bundles_post_ra>
